<compile_context>
chip_gen: v5e
topology: v5e:2x2
jax: 0.10.0
libtpu: 0.0.40
codegen_flags: <defaults>
</compile_context>

<pallas_src>
import math

import jax
import jax.numpy as jnp
from jax import lax
from jax.experimental import pallas as pl
from jax.experimental.pallas import tpu as pltpu

# ----------------------------- config (small) -------------------------------
VOCAB = 64
TYPE_VOCAB = 2
TYPE_PAD = 8          # type table padded to 8 rows in the packed embedding slab
MAX_POS = 16
B = 2                 # batch
S = 8                 # sequence length
BS = B * S            # flattened rows
H = 32                # hidden size
NH = 2                # attention heads
HD = H // NH          # head dim
I = 64                # FFN intermediate size
LAYERS = 2
EPS = 1e-12

EMB_ROWS = VOCAB + TYPE_PAD + S       # 80 gatherable rows in packed emb table
W_ROWS = 2 * H + I                    # 128 rows in the packed weight slab
W_COLS = 4 * H                        # 128 cols in the packed weight slab
VEC_COLS = 128                        # lane width of the packed vector slab
LOG2_S = S.bit_length() - 1

assert S & (S - 1) == 0, "S must be a power of two (shift-based batch index)"
assert W_ROWS == 128 and W_COLS == 128
assert W_COLS >= 3 * H and W_COLS >= I and VEC_COLS >= 3 * H and VEC_COLS >= I


def _layer_norm(x, gamma, beta, eps=EPS):
    # Variance as E[x^2] - mu^2: two independent lane reductions (XLU ILP win).
    mu = jnp.mean(x, axis=-1, keepdims=True)
    ex2 = jnp.mean(x * x, axis=-1, keepdims=True)
    var = jnp.maximum(ex2 - mu * mu, 0.0)
    return (x - mu) * lax.rsqrt(var + eps) * gamma + beta


# --------------------------- fused forward kernel ---------------------------
def fused_text_model_kernel(ids_ref, mask_ref, embtbl_ref, embln_ref,
                            w_ref, vec_ref, cls_ref):
    # ---- embeddings: one-hot gather over the packed [word|type|pos] table ----
    col = lax.broadcasted_iota(jnp.int32, (BS, EMB_ROWS), 1)
    word_id = ids_ref[:, 0:1]                                  # (BS, 1)
    type_id = ids_ref[:, 1:2] + VOCAB                          # (BS, 1)
    pos_id = (lax.broadcasted_iota(jnp.int32, (BS, 1), 0) & (S - 1)) \
        + (VOCAB + TYPE_PAD)                                   # row % S, shifted
    onehot = ((col == word_id) | (col == type_id) | (col == pos_id)
              ).astype(jnp.float32)                            # (BS, EMB_ROWS)
    emb = jnp.dot(onehot, embtbl_ref[...],
                  preferred_element_type=jnp.float32)          # (BS, H), exact
    x = _layer_norm(emb, embln_ref[0:1, :], embln_ref[1:2, :])

    # ---- block-diagonal additive attention bias (built once, f32) -----------
    row_b = jnp.right_shift(lax.broadcasted_iota(jnp.int32, (BS, BS), 0), LOG2_S)
    col_b = jnp.right_shift(lax.broadcasted_iota(jnp.int32, (BS, BS), 1), LOG2_S)
    keep = jnp.logical_and(row_b == col_b, mask_ref[...] != 0)     # (BS, BS)
    bias = jnp.where(keep, 0.0, -1e9).astype(jnp.float32)

    for l in range(LAYERS):                        # LAYERS static: unrolled
        w = w_ref[l]                               # (128, 128) bf16 weight slab
        vec = vec_ref[l]                           # (8, 128)   f32 vector slab

        # Fused QKV projection; 1/sqrt(HD) already folded into wq / bq.
        x_b = x.astype(jnp.bfloat16)
        qkv = jnp.dot(x_b, w[0:H, 0:3 * H],
                      preferred_element_type=jnp.float32) + vec[0:1, 0:3 * H]

        ctx_heads = []
        for h in range(NH):                        # NH static: unrolled
            qh = qkv[:, h * HD:(h + 1) * HD].astype(jnp.bfloat16)
            kh = qkv[:, H + h * HD:H + (h + 1) * HD].astype(jnp.bfloat16)
            vh = qkv[:, 2 * H + h * HD:2 * H + (h + 1) * HD].astype(jnp.bfloat16)
            scores = lax.dot_general(qh, kh, (((1,), (1,)), ((), ())),
                                     preferred_element_type=jnp.float32) + bias
            m = jnp.max(scores, axis=-1, keepdims=True)
            p = jnp.exp(scores - m)                              # f32 exp
            denom = jnp.maximum(jnp.sum(p, axis=-1, keepdims=True), 1e-30)
            p = p * pl.reciprocal(denom, approx=True)            # EUP, not VALU
            ctx_heads.append(jnp.dot(p.astype(jnp.bfloat16), vh,
                                     preferred_element_type=jnp.float32))
        ctx = jnp.concatenate(ctx_heads, axis=-1)  # (BS, H) f32, stays in vregs

        attn_out = jnp.dot(ctx.astype(jnp.bfloat16), w[0:H, 3 * H:4 * H],
                           preferred_element_type=jnp.float32) + vec[1:2, 0:H]
        x = _layer_norm(x + attn_out, vec[2:3, 0:H], vec[3:4, 0:H])

        # FFN
        ff = jnp.dot(x.astype(jnp.bfloat16), w[H:2 * H, 0:I],
                     preferred_element_type=jnp.float32) + vec[4:5, 0:I]
        # TODO(synk): HF BERT uses exact (erf) GELU; tanh approximation used here.
        ff = jax.nn.gelu(ff, approximate=True)
        ff = jnp.dot(ff.astype(jnp.bfloat16), w[2 * H:2 * H + I, 0:H],
                     preferred_element_type=jnp.float32) + vec[5:6, 0:H]
        x = _layer_norm(x + ff, vec[6:7, 0:H], vec[7:8, 0:H])

    # ---- CLS extraction: one-hot select matmul -> single full-width store ---
    SEL_ROWS = 8                                   # pad B up to a sublane group
    sel = (lax.broadcasted_iota(jnp.int32, (SEL_ROWS, BS), 1) ==
           lax.broadcasted_iota(jnp.int32, (SEL_ROWS, BS), 0) * S
           ).astype(jnp.float32)                   # rows >= B select nothing
    cls_all = jnp.dot(sel, x, preferred_element_type=jnp.float32)   # (8, H)
    cls_ref[...] = cls_all[0:B, :]


def fused_text_model(ids2, mask_flat, packed):
    zero2 = lambda i: (0, 0)
    zero3 = lambda i: (0, 0, 0)
    in_specs = [
        pl.BlockSpec((BS, 2), zero2),                  # [input_ids | token_type_ids]
        pl.BlockSpec((1, BS), zero2),                  # attention mask (int32)
        pl.BlockSpec((EMB_ROWS, H), zero2),            # packed word/type/pos table
        pl.BlockSpec((2, H), zero2),                   # emb LN [gamma; beta]
        pl.BlockSpec((LAYERS, W_ROWS, W_COLS), zero3),  # packed weights (bf16)
        pl.BlockSpec((LAYERS, 8, VEC_COLS), zero3),     # packed vectors (f32)
    ]
    return pl.pallas_call(
        fused_text_model_kernel,
        out_shape=jax.ShapeDtypeStruct((B, H), jnp.float32),
        grid_spec=pltpu.PrefetchScalarGridSpec(
            num_scalar_prefetch=0,
            grid=(1,),
            in_specs=in_specs,
            out_specs=pl.BlockSpec((B, H), zero2),
        ),
        compiler_params=pltpu.CompilerParams(
            dimension_semantics=("arbitrary",),
            vmem_limit_bytes=32 * 1024 * 1024),
    )(ids2, mask_flat,
      packed["emb_tbl"], packed["emb_ln"], packed["W"], packed["VEC"])


# ------------------------------ parameter init ------------------------------
def init_params(key):
    ks = iter(jax.random.split(key, 16))
    nrm = lambda k, shp: (0.02 * jax.random.normal(k, shp)).astype(jnp.float32)
    ones = lambda shp: jnp.ones(shp, jnp.float32)
    zeros = lambda shp: jnp.zeros(shp, jnp.float32)
    return {
        "word_emb": nrm(next(ks), (VOCAB, H)),
        "pos_emb": nrm(next(ks), (MAX_POS, H)),
        "type_emb": nrm(next(ks), (TYPE_VOCAB, H)),
        "emb_ln_g": ones((1, H)), "emb_ln_b": zeros((1, H)),
        "wq": nrm(next(ks), (LAYERS, H, H)), "bq": zeros((LAYERS, 1, H)),
        "wk": nrm(next(ks), (LAYERS, H, H)), "bk": zeros((LAYERS, 1, H)),
        "wv": nrm(next(ks), (LAYERS, H, H)), "bv": zeros((LAYERS, 1, H)),
        "wo": nrm(next(ks), (LAYERS, H, H)), "bo": zeros((LAYERS, 1, H)),
        "ln1g": ones((LAYERS, 1, H)), "ln1b": zeros((LAYERS, 1, H)),
        "w1": nrm(next(ks), (LAYERS, H, I)), "b1": zeros((LAYERS, 1, I)),
        "w2": nrm(next(ks), (LAYERS, I, H)), "b2": zeros((LAYERS, 1, H)),
        "ln2g": ones((LAYERS, 1, H)), "ln2b": zeros((LAYERS, 1, H)),
    }


def pack_params(p):
    """Pack per-layer params into consolidated, DMA-friendly kernel operands."""
    scale = 1.0 / math.sqrt(HD)
    pad_c = lambda a, w: jnp.pad(a, ((0, 0), (0, 0), (0, w - a.shape[-1])))

    # Weight slab (LAYERS, 128, 128) bf16: rows 0:H   -> [wq*scale|wk|wv|wo]
    #                                      rows H:2H  -> w1 (cols 0:I)
    #                                      rows 2H:   -> w2 (cols 0:H)
    w_attn = jnp.concatenate([p["wq"] * scale, p["wk"], p["wv"], p["wo"]], axis=-1)
    w_slab = jnp.concatenate(
        [w_attn, pad_c(p["w1"], W_COLS), pad_c(p["w2"], W_COLS)],
        axis=1).astype(jnp.bfloat16)
    assert w_slab.shape == (LAYERS, W_ROWS, W_COLS)

    # Vector slab (LAYERS, 8, 128) f32: one row per small vector.
    row = lambda a: pad_c(a, VEC_COLS)
    bqkv = jnp.concatenate([p["bq"] * scale, p["bk"], p["bv"]], axis=-1)
    vec_slab = jnp.concatenate(
        [row(bqkv), row(p["bo"]), row(p["ln1g"]), row(p["ln1b"]),
         row(p["b1"]), row(p["b2"]), row(p["ln2g"]), row(p["ln2b"])], axis=1)
    assert vec_slab.shape == (LAYERS, 8, VEC_COLS)

    # Embedding table slab (80, H): [word(64) ; type(padded to 8) ; pos(S=8)].
    type_pad = jnp.pad(p["type_emb"], ((0, TYPE_PAD - TYPE_VOCAB), (0, 0)))
    emb_tbl = jnp.concatenate([p["word_emb"], type_pad, p["pos_emb"][:S]], axis=0)
    assert emb_tbl.shape == (EMB_ROWS, H)

    emb_ln = jnp.concatenate([p["emb_ln_g"], p["emb_ln_b"]], axis=0)   # (2, H)
    return {"W": w_slab, "VEC": vec_slab, "emb_tbl": emb_tbl, "emb_ln": emb_ln}


# ------------------------------- forward pass --------------------------------
@jax.jit
def text_model_forward(packed, input_ids, token_type_ids, attention_mask):
    ids2 = jnp.stack([input_ids.reshape(BS).astype(jnp.int32),
                      token_type_ids.reshape(BS).astype(jnp.int32)], axis=-1)
    mask_flat = attention_mask.astype(jnp.int32).reshape(1, BS)
    # Single fused Pallas kernel; returns last_hidden_state[:, 0, :].
    return fused_text_model(ids2, mask_flat, packed)


# --------------------------- pure-JAX references ------------------------------
def _ref_forward_matched(p, input_ids, token_type_ids, attention_mask):
    """Mirrors the kernel's precision policy (bf16 MXU operands, f32 accumulate,
    f32 softmax / LayerNorm) but with an exact softmax divide and direct
    embedding indexing — tight regression check for kernel structure."""
    bf = jnp.bfloat16
    scale = 1.0 / math.sqrt(HD)
    we = jnp.take(p["word_emb"], input_ids, axis=0)
    pe = p["pos_emb"][None, :S, :]
    te = jnp.take(p["type_emb"], token_type_ids, axis=0)
    x = _layer_norm((we + pe + te).reshape(BS, H), p["emb_ln_g"], p["emb_ln_b"])
    mask = attention_mask.reshape(1, BS)
    same_b = (jnp.arange(BS)[:, None] // S) == (jnp.arange(BS)[None, :] // S)
    bias = jnp.where(jnp.logical_and(same_b, mask != 0), 0.0, -1e9).astype(jnp.float32)
    for l in range(LAYERS):
        xb = x.astype(bf)
        q = jnp.dot(xb, (p["wq"][l] * scale).astype(bf),
                    preferred_element_type=jnp.float32) + p["bq"][l] * scale
        k = jnp.dot(xb, p["wk"][l].astype(bf),
                    preferred_element_type=jnp.float32) + p["bk"][l]
        v = jnp.dot(xb, p["wv"][l].astype(bf),
                    preferred_element_type=jnp.float32) + p["bv"][l]
        ctxs = []
        for h in range(NH):
            sl = slice(h * HD, (h + 1) * HD)
            s = jnp.dot(q[:, sl].astype(bf), k[:, sl].astype(bf).T,
                        preferred_element_type=jnp.float32) + bias
            pr = jax.nn.softmax(s, axis=-1)
            ctxs.append(jnp.dot(pr.astype(bf), v[:, sl].astype(bf),
                                preferred_element_type=jnp.float32))
        ctx = jnp.concatenate(ctxs, axis=-1)
        attn = jnp.dot(ctx.astype(bf), p["wo"][l].astype(bf),
                       preferred_element_type=jnp.float32) + p["bo"][l]
        x = _layer_norm(x + attn, p["ln1g"][l], p["ln1b"][l])
        ff = jnp.dot(x.astype(bf), p["w1"][l].astype(bf),
                     preferred_element_type=jnp.float32) + p["b1"][l]
        ff = jax.nn.gelu(ff, approximate=True)
        ff = jnp.dot(ff.astype(bf), p["w2"][l].astype(bf),
                     preferred_element_type=jnp.float32) + p["b2"][l]
        x = _layer_norm(x + ff, p["ln2g"][l], p["ln2b"][l])
    return x.reshape(B, S, H)[:, 0, :]


def _ref_forward_f32(p, input_ids, token_type_ids, attention_mask):
    """Full-precision semantic reference (standard BERT formulation)."""
    we = jnp.take(p["word_emb"], input_ids, axis=0)
    pe = p["pos_emb"][None, :S, :]
    te = jnp.take(p["type_emb"], token_type_ids, axis=0)
    x = _layer_norm(we + pe + te, p["emb_ln_g"], p["emb_ln_b"])
    bias = ((1.0 - attention_mask.astype(jnp.float32)) * -1e9)[:, None, None, :]
    for l in range(LAYERS):
        q = (x @ p["wq"][l] + p["bq"][l]).reshape(B, S, NH, HD)
        k = (x @ p["wk"][l] + p["bk"][l]).reshape(B, S, NH, HD)
        v = (x @ p["wv"][l] + p["bv"][l]).reshape(B, S, NH, HD)
        scores = jnp.einsum("bqhd,bkhd->bhqk", q, k) / math.sqrt(HD) + bias
        pr = jax.nn.softmax(scores, axis=-1)
        ctx = jnp.einsum("bhqk,bkhd->bqhd", pr, v).reshape(B, S, H)
        attn = ctx @ p["wo"][l] + p["bo"][l]
        x = _layer_norm(x + attn, p["ln1g"][l], p["ln1b"][l])
        ff = jax.nn.gelu(x @ p["w1"][l] + p["b1"][l], approximate=True)
        ff = ff @ p["w2"][l] + p["b2"][l]
        x = _layer_norm(x + ff, p["ln2g"][l], p["ln2b"][l])
    return x[:, 0, :]


if __name__ == "__main__":
    key = jax.random.PRNGKey(0)
    pkey, ikey = jax.random.split(key)
    raw = init_params(pkey)
    packed = pack_params(raw)

    input_ids = jax.random.randint(ikey, (B, S), 0, VOCAB, dtype=jnp.int32)
    token_type_ids = jnp.zeros((B, S), jnp.int32)
    attention_mask = jnp.ones((B, S), jnp.int32).at[1, S - 2:].set(0)

    cls = text_model_forward(packed, input_ids, token_type_ids, attention_mask)
    cls = jax.block_until_ready(cls)
    assert cls.shape == (B, H) and cls.dtype == jnp.float32

    # Tight check vs. a reference that mirrors the kernel's precision policy
    # (covers approx-reciprocal + accumulation-order differences only).
    ref_m = _ref_forward_matched(raw, input_ids, token_type_ids, attention_mask)
    err_m = float(jnp.max(jnp.abs(cls - ref_m)))
    assert err_m < 5e-3, f"mismatch vs matched reference: max abs err {err_m}"

    # Looser check vs. the full-f32 semantic reference (bounds bf16 quantization).
    ref_f = _ref_forward_f32(raw, input_ids, token_type_ids, attention_mask)
    err_f = float(jnp.max(jnp.abs(cls - ref_f)))
    assert err_f < 1e-2, f"mismatch vs f32 reference: max abs err {err_f}"

    print("KERNEL_OK")
</pallas_src>

<mosaic_0001>
module attributes {stable_mosaic.version = 11 : i64} {
  func.func @fused_text_model_kernel(%arg0: i32, %arg1: memref<16x2xi32, #tpu.memory_space<vmem>>, %arg2: memref<1x16xi32, #tpu.memory_space<vmem>>, %arg3: memref<80x32xf32, #tpu.memory_space<vmem>>, %arg4: memref<2x32xf32, #tpu.memory_space<vmem>>, %arg5: memref<2x128x128xbf16, #tpu.memory_space<vmem>>, %arg6: memref<2x8x128xf32, #tpu.memory_space<vmem>>, %arg7: memref<2x32xf32, #tpu.memory_space<vmem>>) attributes {dimension_semantics = [#tpu.dimension_semantics<arbitrary>], iteration_bounds = array<i64: 1>, scalar_prefetch = 0 : i64, scratch_operands = 0 : i64, tpu.core_type = #tpu.core_type<tc>, window_params = [{pipeline_mode = #tpu.pipeline_mode<synchronous>, transform_indices = @transform_0, window_bounds = array<i64: 16, 2>}, {pipeline_mode = #tpu.pipeline_mode<synchronous>, transform_indices = @transform_1, window_bounds = array<i64: 1, 16>}, {pipeline_mode = #tpu.pipeline_mode<synchronous>, transform_indices = @transform_2, window_bounds = array<i64: 80, 32>}, {pipeline_mode = #tpu.pipeline_mode<synchronous>, transform_indices = @transform_3, window_bounds = array<i64: 2, 32>}, {pipeline_mode = #tpu.pipeline_mode<synchronous>, transform_indices = @transform_4, window_bounds = array<i64: 2, 128, 128>}, {pipeline_mode = #tpu.pipeline_mode<synchronous>, transform_indices = @transform_5, window_bounds = array<i64: 2, 8, 128>}, {pipeline_mode = #tpu.pipeline_mode<synchronous>, transform_indices = @transform_6, window_bounds = array<i64: 2, 32>}]} {
    %0 = tpu.iota {dimensions = array<i32: 1>} : vector<16x80xi32>
    %c0 = arith.constant 0 : index
    %c0_0 = arith.constant 0 : index
    %1 = vector.load %arg1[%c0, %c0_0] : memref<16x2xi32, #tpu.memory_space<vmem>>, vector<16x1xi32>
    %c0_1 = arith.constant 0 : index
    %c1 = arith.constant 1 : index
    %2 = vector.load %arg1[%c0_1, %c1] : memref<16x2xi32, #tpu.memory_space<vmem>>, vector<16x1xi32>
    %c64_i32 = arith.constant 64 : i32
    %3 = vector.broadcast %c64_i32 : i32 to vector<16x1xi32>
    %4 = arith.addi %2, %3 : vector<16x1xi32>
    %5 = tpu.iota {dimensions = array<i32: 0>} : vector<16x1xi32>
    %c7_i32 = arith.constant 7 : i32
    %6 = vector.broadcast %c7_i32 : i32 to vector<16x1xi32>
    %7 = arith.andi %5, %6 : vector<16x1xi32>
    %c72_i32 = arith.constant 72 : i32
    %8 = vector.broadcast %c72_i32 : i32 to vector<16x1xi32>
    %9 = arith.addi %7, %8 : vector<16x1xi32>
    %10 = vector.broadcast %1 : vector<16x1xi32> to vector<16x80xi32>
    %11 = arith.cmpi eq, %0, %10 : vector<16x80xi32>
    %12 = vector.broadcast %4 : vector<16x1xi32> to vector<16x80xi32>
    %13 = arith.cmpi eq, %0, %12 : vector<16x80xi32>
    %14 = arith.ori %11, %13 : vector<16x80xi1>
    %15 = vector.broadcast %9 : vector<16x1xi32> to vector<16x80xi32>
    %16 = arith.cmpi eq, %0, %15 : vector<16x80xi32>
    %17 = arith.ori %14, %16 : vector<16x80xi1>
    %18 = arith.extui %17 : vector<16x80xi1> to vector<16x80xi32>
    %19 = arith.sitofp %18 : vector<16x80xi32> to vector<16x80xf32>
    %c0_2 = arith.constant 0 : index
    %c0_3 = arith.constant 0 : index
    %20 = vector.load %arg3[%c0_2, %c0_3] : memref<80x32xf32, #tpu.memory_space<vmem>>, vector<80x32xf32>
    %cst = arith.constant dense<0.000000e+00> : vector<16x32xf32>
    %21 = tpu.matmul %19, %20, %cst {dimension_numbers = #tpu.dot_dimension_numbers<[1], [0], [0], [1], [0, 0, 1, 1], [], []>} : vector<16x80xf32>, vector<80x32xf32>, vector<16x32xf32> -> vector<16x32xf32>
    %c0_4 = arith.constant 0 : index
    %c0_5 = arith.constant 0 : index
    %22 = vector.load %arg4[%c0_4, %c0_5] : memref<2x32xf32, #tpu.memory_space<vmem>>, vector<1x32xf32>
    %c1_6 = arith.constant 1 : index
    %c0_7 = arith.constant 0 : index
    %23 = vector.load %arg4[%c1_6, %c0_7] : memref<2x32xf32, #tpu.memory_space<vmem>>, vector<1x32xf32>
    %cst_8 = arith.constant dense<0.000000e+00> : vector<16xf32>
    %24 = vector.multi_reduction <add>, %21, %cst_8 [1] : vector<16x32xf32> to vector<16xf32>
    %25 = vector.shape_cast %24 : vector<16xf32> to vector<16x1xf32>
    %cst_9 = arith.constant 3.200000e+01 : f32
    %26 = vector.broadcast %cst_9 : f32 to vector<16x1xf32>
    %27 = arith.divf %25, %26 : vector<16x1xf32>
    %28 = arith.mulf %21, %21 : vector<16x32xf32>
    %cst_10 = arith.constant dense<0.000000e+00> : vector<16xf32>
    %29 = vector.multi_reduction <add>, %28, %cst_10 [1] : vector<16x32xf32> to vector<16xf32>
    %30 = vector.shape_cast %29 : vector<16xf32> to vector<16x1xf32>
    %cst_11 = arith.constant 3.200000e+01 : f32
    %31 = vector.broadcast %cst_11 : f32 to vector<16x1xf32>
    %32 = arith.divf %30, %31 : vector<16x1xf32>
    %33 = arith.mulf %27, %27 : vector<16x1xf32>
    %34 = arith.subf %32, %33 : vector<16x1xf32>
    %cst_12 = arith.constant 0.000000e+00 : f32
    %35 = vector.broadcast %cst_12 : f32 to vector<16x1xf32>
    %36 = arith.maximumf %34, %35 : vector<16x1xf32>
    %37 = vector.broadcast %27 : vector<16x1xf32> to vector<16x32xf32>
    %38 = arith.subf %21, %37 : vector<16x32xf32>
    %cst_13 = arith.constant 9.99999996E-13 : f32
    %39 = vector.broadcast %cst_13 : f32 to vector<16x1xf32>
    %40 = arith.addf %36, %39 : vector<16x1xf32>
    %41 = math.rsqrt %40 : vector<16x1xf32>
    %42 = vector.broadcast %41 : vector<16x1xf32> to vector<16x32xf32>
    %43 = arith.mulf %38, %42 : vector<16x32xf32>
    %44 = vector.broadcast %22 : vector<1x32xf32> to vector<16x32xf32>
    %45 = arith.mulf %43, %44 : vector<16x32xf32>
    %46 = vector.broadcast %23 : vector<1x32xf32> to vector<16x32xf32>
    %47 = arith.addf %45, %46 : vector<16x32xf32>
    %48 = tpu.iota {dimensions = array<i32: 0>} : vector<16x16xi32>
    %c3_i32 = arith.constant 3 : i32
    %49 = vector.broadcast %c3_i32 : i32 to vector<16x16xi32>
    %50 = arith.shrsi %48, %49 : vector<16x16xi32>
    %51 = tpu.iota {dimensions = array<i32: 1>} : vector<16x16xi32>
    %c3_i32_14 = arith.constant 3 : i32
    %52 = vector.broadcast %c3_i32_14 : i32 to vector<16x16xi32>
    %53 = arith.shrsi %51, %52 : vector<16x16xi32>
    %54 = arith.cmpi eq, %50, %53 : vector<16x16xi32>
    %c0_15 = arith.constant 0 : index
    %c0_16 = arith.constant 0 : index
    %55 = vector.load %arg2[%c0_15, %c0_16] : memref<1x16xi32, #tpu.memory_space<vmem>>, vector<1x16xi32>
    %c0_i32 = arith.constant 0 : i32
    %56 = vector.broadcast %c0_i32 : i32 to vector<1x16xi32>
    %57 = arith.cmpi ne, %55, %56 : vector<1x16xi32>
    %58 = vector.broadcast %57 : vector<1x16xi1> to vector<16x16xi1>
    %59 = arith.andi %54, %58 : vector<16x16xi1>
    %cst_17 = arith.constant 0.000000e+00 : f32
    %cst_18 = arith.constant -1.000000e+09 : f32
    %60 = vector.broadcast %cst_17 : f32 to vector<16x16xf32>
    %61 = vector.broadcast %cst_18 : f32 to vector<16x16xf32>
    %62 = arith.select %59, %60, %61 : vector<16x16xi1>, vector<16x16xf32>
    %c0_19 = arith.constant 0 : index
    %c0_20 = arith.constant 0 : index
    %c0_21 = arith.constant 0 : index
    %63 = vector.load %arg5[%c0_19, %c0_20, %c0_21] : memref<2x128x128xbf16, #tpu.memory_space<vmem>>, vector<1x128x128xbf16>
    %64 = vector.shape_cast %63 : vector<1x128x128xbf16> to vector<128x128xbf16>
    %c0_22 = arith.constant 0 : index
    %c0_23 = arith.constant 0 : index
    %c0_24 = arith.constant 0 : index
    %65 = vector.load %arg6[%c0_22, %c0_23, %c0_24] : memref<2x8x128xf32, #tpu.memory_space<vmem>>, vector<1x8x128xf32>
    %66 = vector.shape_cast %65 : vector<1x8x128xf32> to vector<8x128xf32>
    %67 = arith.truncf %47 : vector<16x32xf32> to vector<16x32xbf16>
    %68 = vector.extract_strided_slice %64 {offsets = [0, 0], sizes = [32, 96], strides = [1, 1]} : vector<128x128xbf16> to vector<32x96xbf16>
    %cst_25 = arith.constant dense<0.000000e+00> : vector<16x96xf32>
    %69 = tpu.matmul %67, %68, %cst_25 {dimension_numbers = #tpu.dot_dimension_numbers<[1], [0], [0], [1], [0, 0, 1, 1], [], []>} : vector<16x32xbf16>, vector<32x96xbf16>, vector<16x96xf32> -> vector<16x96xf32>
    %70 = vector.extract_strided_slice %66 {offsets = [0, 0], sizes = [1, 96], strides = [1, 1]} : vector<8x128xf32> to vector<1x96xf32>
    %71 = vector.broadcast %70 : vector<1x96xf32> to vector<16x96xf32>
    %72 = arith.addf %69, %71 : vector<16x96xf32>
    %73 = vector.extract_strided_slice %72 {offsets = [0, 0], sizes = [16, 16], strides = [1, 1]} : vector<16x96xf32> to vector<16x16xf32>
    %74 = arith.truncf %73 : vector<16x16xf32> to vector<16x16xbf16>
    %75 = vector.extract_strided_slice %72 {offsets = [0, 32], sizes = [16, 16], strides = [1, 1]} : vector<16x96xf32> to vector<16x16xf32>
    %76 = arith.truncf %75 : vector<16x16xf32> to vector<16x16xbf16>
    %77 = vector.extract_strided_slice %72 {offsets = [0, 64], sizes = [16, 16], strides = [1, 1]} : vector<16x96xf32> to vector<16x16xf32>
    %78 = arith.truncf %77 : vector<16x16xf32> to vector<16x16xbf16>
    %cst_26 = arith.constant dense<0.000000e+00> : vector<16x16xf32>
    %79 = tpu.matmul %74, %76, %cst_26 {dimension_numbers = #tpu.dot_dimension_numbers<[1], [1], [0], [0], [0, 0, 1, 0], [], []>} : vector<16x16xbf16>, vector<16x16xbf16>, vector<16x16xf32> -> vector<16x16xf32>
    %80 = arith.addf %79, %62 : vector<16x16xf32>
    %cst_27 = arith.constant dense<0xFF800000> : vector<16xf32>
    %81 = vector.multi_reduction <maximumf>, %80, %cst_27 [1] : vector<16x16xf32> to vector<16xf32>
    %82 = vector.shape_cast %81 : vector<16xf32> to vector<16x1xf32>
    %83 = vector.broadcast %82 : vector<16x1xf32> to vector<16x16xf32>
    %84 = arith.subf %80, %83 : vector<16x16xf32>
    %85 = math.exp %84 : vector<16x16xf32>
    %cst_28 = arith.constant dense<0.000000e+00> : vector<16xf32>
    %86 = vector.multi_reduction <add>, %85, %cst_28 [1] : vector<16x16xf32> to vector<16xf32>
    %87 = vector.shape_cast %86 : vector<16xf32> to vector<16x1xf32>
    %cst_29 = arith.constant 1.000000e-30 : f32
    %88 = vector.broadcast %cst_29 : f32 to vector<16x1xf32>
    %89 = arith.maximumf %87, %88 : vector<16x1xf32>
    %90 = tpu.reciprocal %89 {approx = true} : vector<16x1xf32> -> vector<16x1xf32>
    %91 = vector.broadcast %90 : vector<16x1xf32> to vector<16x16xf32>
    %92 = arith.mulf %85, %91 : vector<16x16xf32>
    %93 = arith.truncf %92 : vector<16x16xf32> to vector<16x16xbf16>
    %cst_30 = arith.constant dense<0.000000e+00> : vector<16x16xf32>
    %94 = tpu.matmul %93, %78, %cst_30 {dimension_numbers = #tpu.dot_dimension_numbers<[1], [0], [0], [1], [0, 0, 1, 1], [], []>} : vector<16x16xbf16>, vector<16x16xbf16>, vector<16x16xf32> -> vector<16x16xf32>
    %95 = vector.extract_strided_slice %72 {offsets = [0, 16], sizes = [16, 16], strides = [1, 1]} : vector<16x96xf32> to vector<16x16xf32>
    %96 = arith.truncf %95 : vector<16x16xf32> to vector<16x16xbf16>
    %97 = vector.extract_strided_slice %72 {offsets = [0, 48], sizes = [16, 16], strides = [1, 1]} : vector<16x96xf32> to vector<16x16xf32>
    %98 = arith.truncf %97 : vector<16x16xf32> to vector<16x16xbf16>
    %99 = vector.extract_strided_slice %72 {offsets = [0, 80], sizes = [16, 16], strides = [1, 1]} : vector<16x96xf32> to vector<16x16xf32>
    %100 = arith.truncf %99 : vector<16x16xf32> to vector<16x16xbf16>
    %cst_31 = arith.constant dense<0.000000e+00> : vector<16x16xf32>
    %101 = tpu.matmul %96, %98, %cst_31 {dimension_numbers = #tpu.dot_dimension_numbers<[1], [1], [0], [0], [0, 0, 1, 0], [], []>} : vector<16x16xbf16>, vector<16x16xbf16>, vector<16x16xf32> -> vector<16x16xf32>
    %102 = arith.addf %101, %62 : vector<16x16xf32>
    %cst_32 = arith.constant dense<0xFF800000> : vector<16xf32>
    %103 = vector.multi_reduction <maximumf>, %102, %cst_32 [1] : vector<16x16xf32> to vector<16xf32>
    %104 = vector.shape_cast %103 : vector<16xf32> to vector<16x1xf32>
    %105 = vector.broadcast %104 : vector<16x1xf32> to vector<16x16xf32>
    %106 = arith.subf %102, %105 : vector<16x16xf32>
    %107 = math.exp %106 : vector<16x16xf32>
    %cst_33 = arith.constant dense<0.000000e+00> : vector<16xf32>
    %108 = vector.multi_reduction <add>, %107, %cst_33 [1] : vector<16x16xf32> to vector<16xf32>
    %109 = vector.shape_cast %108 : vector<16xf32> to vector<16x1xf32>
    %cst_34 = arith.constant 1.000000e-30 : f32
    %110 = vector.broadcast %cst_34 : f32 to vector<16x1xf32>
    %111 = arith.maximumf %109, %110 : vector<16x1xf32>
    %112 = tpu.reciprocal %111 {approx = true} : vector<16x1xf32> -> vector<16x1xf32>
    %113 = vector.broadcast %112 : vector<16x1xf32> to vector<16x16xf32>
    %114 = arith.mulf %107, %113 : vector<16x16xf32>
    %115 = arith.truncf %114 : vector<16x16xf32> to vector<16x16xbf16>
    %cst_35 = arith.constant dense<0.000000e+00> : vector<16x16xf32>
    %116 = tpu.matmul %115, %100, %cst_35 {dimension_numbers = #tpu.dot_dimension_numbers<[1], [0], [0], [1], [0, 0, 1, 1], [], []>} : vector<16x16xbf16>, vector<16x16xbf16>, vector<16x16xf32> -> vector<16x16xf32>
    %117 = tpu.concatenate %94, %116 in 1 : vector<16x16xf32>, vector<16x16xf32> -> vector<16x32xf32>
    %118 = arith.truncf %117 : vector<16x32xf32> to vector<16x32xbf16>
    %119 = vector.extract_strided_slice %64 {offsets = [0, 96], sizes = [32, 32], strides = [1, 1]} : vector<128x128xbf16> to vector<32x32xbf16>
    %cst_36 = arith.constant dense<0.000000e+00> : vector<16x32xf32>
    %120 = tpu.matmul %118, %119, %cst_36 {dimension_numbers = #tpu.dot_dimension_numbers<[1], [0], [0], [1], [0, 0, 1, 1], [], []>} : vector<16x32xbf16>, vector<32x32xbf16>, vector<16x32xf32> -> vector<16x32xf32>
    %121 = vector.extract_strided_slice %66 {offsets = [1, 0], sizes = [1, 32], strides = [1, 1]} : vector<8x128xf32> to vector<1x32xf32>
    %122 = vector.broadcast %121 : vector<1x32xf32> to vector<16x32xf32>
    %123 = arith.addf %120, %122 : vector<16x32xf32>
    %124 = arith.addf %47, %123 : vector<16x32xf32>
    %125 = vector.extract_strided_slice %66 {offsets = [2, 0], sizes = [1, 32], strides = [1, 1]} : vector<8x128xf32> to vector<1x32xf32>
    %126 = vector.extract_strided_slice %66 {offsets = [3, 0], sizes = [1, 32], strides = [1, 1]} : vector<8x128xf32> to vector<1x32xf32>
    %cst_37 = arith.constant dense<0.000000e+00> : vector<16xf32>
    %127 = vector.multi_reduction <add>, %124, %cst_37 [1] : vector<16x32xf32> to vector<16xf32>
    %128 = vector.shape_cast %127 : vector<16xf32> to vector<16x1xf32>
    %cst_38 = arith.constant 3.200000e+01 : f32
    %129 = vector.broadcast %cst_38 : f32 to vector<16x1xf32>
    %130 = arith.divf %128, %129 : vector<16x1xf32>
    %131 = arith.mulf %124, %124 : vector<16x32xf32>
    %cst_39 = arith.constant dense<0.000000e+00> : vector<16xf32>
    %132 = vector.multi_reduction <add>, %131, %cst_39 [1] : vector<16x32xf32> to vector<16xf32>
    %133 = vector.shape_cast %132 : vector<16xf32> to vector<16x1xf32>
    %cst_40 = arith.constant 3.200000e+01 : f32
    %134 = vector.broadcast %cst_40 : f32 to vector<16x1xf32>
    %135 = arith.divf %133, %134 : vector<16x1xf32>
    %136 = arith.mulf %130, %130 : vector<16x1xf32>
    %137 = arith.subf %135, %136 : vector<16x1xf32>
    %cst_41 = arith.constant 0.000000e+00 : f32
    %138 = vector.broadcast %cst_41 : f32 to vector<16x1xf32>
    %139 = arith.maximumf %137, %138 : vector<16x1xf32>
    %140 = vector.broadcast %130 : vector<16x1xf32> to vector<16x32xf32>
    %141 = arith.subf %124, %140 : vector<16x32xf32>
    %cst_42 = arith.constant 9.99999996E-13 : f32
    %142 = vector.broadcast %cst_42 : f32 to vector<16x1xf32>
    %143 = arith.addf %139, %142 : vector<16x1xf32>
    %144 = math.rsqrt %143 : vector<16x1xf32>
    %145 = vector.broadcast %144 : vector<16x1xf32> to vector<16x32xf32>
    %146 = arith.mulf %141, %145 : vector<16x32xf32>
    %147 = vector.broadcast %125 : vector<1x32xf32> to vector<16x32xf32>
    %148 = arith.mulf %146, %147 : vector<16x32xf32>
    %149 = vector.broadcast %126 : vector<1x32xf32> to vector<16x32xf32>
    %150 = arith.addf %148, %149 : vector<16x32xf32>
    %151 = arith.truncf %150 : vector<16x32xf32> to vector<16x32xbf16>
    %152 = vector.extract_strided_slice %64 {offsets = [32, 0], sizes = [32, 64], strides = [1, 1]} : vector<128x128xbf16> to vector<32x64xbf16>
    %cst_43 = arith.constant dense<0.000000e+00> : vector<16x64xf32>
    %153 = tpu.matmul %151, %152, %cst_43 {dimension_numbers = #tpu.dot_dimension_numbers<[1], [0], [0], [1], [0, 0, 1, 1], [], []>} : vector<16x32xbf16>, vector<32x64xbf16>, vector<16x64xf32> -> vector<16x64xf32>
    %154 = vector.extract_strided_slice %66 {offsets = [4, 0], sizes = [1, 64], strides = [1, 1]} : vector<8x128xf32> to vector<1x64xf32>
    %155 = vector.broadcast %154 : vector<1x64xf32> to vector<16x64xf32>
    %156 = arith.addf %153, %155 : vector<16x64xf32>
    %157 = arith.mulf %156, %156 : vector<16x64xf32>
    %158 = arith.mulf %156, %157 : vector<16x64xf32>
    %cst_44 = arith.constant 4.471500e-02 : f32
    %159 = vector.broadcast %cst_44 : f32 to vector<16x64xf32>
    %160 = arith.mulf %159, %158 : vector<16x64xf32>
    %161 = arith.addf %156, %160 : vector<16x64xf32>
    %cst_45 = arith.constant 0.797884583 : f32
    %162 = vector.broadcast %cst_45 : f32 to vector<16x64xf32>
    %163 = arith.mulf %162, %161 : vector<16x64xf32>
    %164 = math.tanh %163 : vector<16x64xf32>
    %cst_46 = arith.constant 1.000000e+00 : f32
    %165 = vector.broadcast %cst_46 : f32 to vector<16x64xf32>
    %166 = arith.addf %165, %164 : vector<16x64xf32>
    %cst_47 = arith.constant 5.000000e-01 : f32
    %167 = vector.broadcast %cst_47 : f32 to vector<16x64xf32>
    %168 = arith.mulf %167, %166 : vector<16x64xf32>
    %169 = arith.mulf %156, %168 : vector<16x64xf32>
    %170 = arith.truncf %169 : vector<16x64xf32> to vector<16x64xbf16>
    %171 = vector.extract_strided_slice %64 {offsets = [64, 0], sizes = [64, 32], strides = [1, 1]} : vector<128x128xbf16> to vector<64x32xbf16>
    %cst_48 = arith.constant dense<0.000000e+00> : vector<16x32xf32>
    %172 = tpu.matmul %170, %171, %cst_48 {dimension_numbers = #tpu.dot_dimension_numbers<[1], [0], [0], [1], [0, 0, 1, 1], [], []>} : vector<16x64xbf16>, vector<64x32xbf16>, vector<16x32xf32> -> vector<16x32xf32>
    %173 = vector.extract_strided_slice %66 {offsets = [5, 0], sizes = [1, 32], strides = [1, 1]} : vector<8x128xf32> to vector<1x32xf32>
    %174 = vector.broadcast %173 : vector<1x32xf32> to vector<16x32xf32>
    %175 = arith.addf %172, %174 : vector<16x32xf32>
    %176 = arith.addf %150, %175 : vector<16x32xf32>
    %177 = vector.extract_strided_slice %66 {offsets = [6, 0], sizes = [1, 32], strides = [1, 1]} : vector<8x128xf32> to vector<1x32xf32>
    %178 = vector.extract_strided_slice %66 {offsets = [7, 0], sizes = [1, 32], strides = [1, 1]} : vector<8x128xf32> to vector<1x32xf32>
    %cst_49 = arith.constant dense<0.000000e+00> : vector<16xf32>
    %179 = vector.multi_reduction <add>, %176, %cst_49 [1] : vector<16x32xf32> to vector<16xf32>
    %180 = vector.shape_cast %179 : vector<16xf32> to vector<16x1xf32>
    %cst_50 = arith.constant 3.200000e+01 : f32
    %181 = vector.broadcast %cst_50 : f32 to vector<16x1xf32>
    %182 = arith.divf %180, %181 : vector<16x1xf32>
    %183 = arith.mulf %176, %176 : vector<16x32xf32>
    %cst_51 = arith.constant dense<0.000000e+00> : vector<16xf32>
    %184 = vector.multi_reduction <add>, %183, %cst_51 [1] : vector<16x32xf32> to vector<16xf32>
    %185 = vector.shape_cast %184 : vector<16xf32> to vector<16x1xf32>
    %cst_52 = arith.constant 3.200000e+01 : f32
    %186 = vector.broadcast %cst_52 : f32 to vector<16x1xf32>
    %187 = arith.divf %185, %186 : vector<16x1xf32>
    %188 = arith.mulf %182, %182 : vector<16x1xf32>
    %189 = arith.subf %187, %188 : vector<16x1xf32>
    %cst_53 = arith.constant 0.000000e+00 : f32
    %190 = vector.broadcast %cst_53 : f32 to vector<16x1xf32>
    %191 = arith.maximumf %189, %190 : vector<16x1xf32>
    %192 = vector.broadcast %182 : vector<16x1xf32> to vector<16x32xf32>
    %193 = arith.subf %176, %192 : vector<16x32xf32>
    %cst_54 = arith.constant 9.99999996E-13 : f32
    %194 = vector.broadcast %cst_54 : f32 to vector<16x1xf32>
    %195 = arith.addf %191, %194 : vector<16x1xf32>
    %196 = math.rsqrt %195 : vector<16x1xf32>
    %197 = vector.broadcast %196 : vector<16x1xf32> to vector<16x32xf32>
    %198 = arith.mulf %193, %197 : vector<16x32xf32>
    %199 = vector.broadcast %177 : vector<1x32xf32> to vector<16x32xf32>
    %200 = arith.mulf %198, %199 : vector<16x32xf32>
    %201 = vector.broadcast %178 : vector<1x32xf32> to vector<16x32xf32>
    %202 = arith.addf %200, %201 : vector<16x32xf32>
    %c1_55 = arith.constant 1 : index
    %c0_56 = arith.constant 0 : index
    %c0_57 = arith.constant 0 : index
    %203 = vector.load %arg5[%c1_55, %c0_56, %c0_57] : memref<2x128x128xbf16, #tpu.memory_space<vmem>>, vector<1x128x128xbf16>
    %204 = vector.shape_cast %203 : vector<1x128x128xbf16> to vector<128x128xbf16>
    %c1_58 = arith.constant 1 : index
    %c0_59 = arith.constant 0 : index
    %c0_60 = arith.constant 0 : index
    %205 = vector.load %arg6[%c1_58, %c0_59, %c0_60] : memref<2x8x128xf32, #tpu.memory_space<vmem>>, vector<1x8x128xf32>
    %206 = vector.shape_cast %205 : vector<1x8x128xf32> to vector<8x128xf32>
    %207 = arith.truncf %202 : vector<16x32xf32> to vector<16x32xbf16>
    %208 = vector.extract_strided_slice %204 {offsets = [0, 0], sizes = [32, 96], strides = [1, 1]} : vector<128x128xbf16> to vector<32x96xbf16>
    %cst_61 = arith.constant dense<0.000000e+00> : vector<16x96xf32>
    %209 = tpu.matmul %207, %208, %cst_61 {dimension_numbers = #tpu.dot_dimension_numbers<[1], [0], [0], [1], [0, 0, 1, 1], [], []>} : vector<16x32xbf16>, vector<32x96xbf16>, vector<16x96xf32> -> vector<16x96xf32>
    %210 = vector.extract_strided_slice %206 {offsets = [0, 0], sizes = [1, 96], strides = [1, 1]} : vector<8x128xf32> to vector<1x96xf32>
    %211 = vector.broadcast %210 : vector<1x96xf32> to vector<16x96xf32>
    %212 = arith.addf %209, %211 : vector<16x96xf32>
    %213 = vector.extract_strided_slice %212 {offsets = [0, 0], sizes = [16, 16], strides = [1, 1]} : vector<16x96xf32> to vector<16x16xf32>
    %214 = arith.truncf %213 : vector<16x16xf32> to vector<16x16xbf16>
    %215 = vector.extract_strided_slice %212 {offsets = [0, 32], sizes = [16, 16], strides = [1, 1]} : vector<16x96xf32> to vector<16x16xf32>
    %216 = arith.truncf %215 : vector<16x16xf32> to vector<16x16xbf16>
    %217 = vector.extract_strided_slice %212 {offsets = [0, 64], sizes = [16, 16], strides = [1, 1]} : vector<16x96xf32> to vector<16x16xf32>
    %218 = arith.truncf %217 : vector<16x16xf32> to vector<16x16xbf16>
    %cst_62 = arith.constant dense<0.000000e+00> : vector<16x16xf32>
    %219 = tpu.matmul %214, %216, %cst_62 {dimension_numbers = #tpu.dot_dimension_numbers<[1], [1], [0], [0], [0, 0, 1, 0], [], []>} : vector<16x16xbf16>, vector<16x16xbf16>, vector<16x16xf32> -> vector<16x16xf32>
    %220 = arith.addf %219, %62 : vector<16x16xf32>
    %cst_63 = arith.constant dense<0xFF800000> : vector<16xf32>
    %221 = vector.multi_reduction <maximumf>, %220, %cst_63 [1] : vector<16x16xf32> to vector<16xf32>
    %222 = vector.shape_cast %221 : vector<16xf32> to vector<16x1xf32>
    %223 = vector.broadcast %222 : vector<16x1xf32> to vector<16x16xf32>
    %224 = arith.subf %220, %223 : vector<16x16xf32>
    %225 = math.exp %224 : vector<16x16xf32>
    %cst_64 = arith.constant dense<0.000000e+00> : vector<16xf32>
    %226 = vector.multi_reduction <add>, %225, %cst_64 [1] : vector<16x16xf32> to vector<16xf32>
    %227 = vector.shape_cast %226 : vector<16xf32> to vector<16x1xf32>
    %cst_65 = arith.constant 1.000000e-30 : f32
    %228 = vector.broadcast %cst_65 : f32 to vector<16x1xf32>
    %229 = arith.maximumf %227, %228 : vector<16x1xf32>
    %230 = tpu.reciprocal %229 {approx = true} : vector<16x1xf32> -> vector<16x1xf32>
    %231 = vector.broadcast %230 : vector<16x1xf32> to vector<16x16xf32>
    %232 = arith.mulf %225, %231 : vector<16x16xf32>
    %233 = arith.truncf %232 : vector<16x16xf32> to vector<16x16xbf16>
    %cst_66 = arith.constant dense<0.000000e+00> : vector<16x16xf32>
    %234 = tpu.matmul %233, %218, %cst_66 {dimension_numbers = #tpu.dot_dimension_numbers<[1], [0], [0], [1], [0, 0, 1, 1], [], []>} : vector<16x16xbf16>, vector<16x16xbf16>, vector<16x16xf32> -> vector<16x16xf32>
    %235 = vector.extract_strided_slice %212 {offsets = [0, 16], sizes = [16, 16], strides = [1, 1]} : vector<16x96xf32> to vector<16x16xf32>
    %236 = arith.truncf %235 : vector<16x16xf32> to vector<16x16xbf16>
    %237 = vector.extract_strided_slice %212 {offsets = [0, 48], sizes = [16, 16], strides = [1, 1]} : vector<16x96xf32> to vector<16x16xf32>
    %238 = arith.truncf %237 : vector<16x16xf32> to vector<16x16xbf16>
    %239 = vector.extract_strided_slice %212 {offsets = [0, 80], sizes = [16, 16], strides = [1, 1]} : vector<16x96xf32> to vector<16x16xf32>
    %240 = arith.truncf %239 : vector<16x16xf32> to vector<16x16xbf16>
    %cst_67 = arith.constant dense<0.000000e+00> : vector<16x16xf32>
    %241 = tpu.matmul %236, %238, %cst_67 {dimension_numbers = #tpu.dot_dimension_numbers<[1], [1], [0], [0], [0, 0, 1, 0], [], []>} : vector<16x16xbf16>, vector<16x16xbf16>, vector<16x16xf32> -> vector<16x16xf32>
    %242 = arith.addf %241, %62 : vector<16x16xf32>
    %cst_68 = arith.constant dense<0xFF800000> : vector<16xf32>
    %243 = vector.multi_reduction <maximumf>, %242, %cst_68 [1] : vector<16x16xf32> to vector<16xf32>
    %244 = vector.shape_cast %243 : vector<16xf32> to vector<16x1xf32>
    %245 = vector.broadcast %244 : vector<16x1xf32> to vector<16x16xf32>
    %246 = arith.subf %242, %245 : vector<16x16xf32>
    %247 = math.exp %246 : vector<16x16xf32>
    %cst_69 = arith.constant dense<0.000000e+00> : vector<16xf32>
    %248 = vector.multi_reduction <add>, %247, %cst_69 [1] : vector<16x16xf32> to vector<16xf32>
    %249 = vector.shape_cast %248 : vector<16xf32> to vector<16x1xf32>
    %cst_70 = arith.constant 1.000000e-30 : f32
    %250 = vector.broadcast %cst_70 : f32 to vector<16x1xf32>
    %251 = arith.maximumf %249, %250 : vector<16x1xf32>
    %252 = tpu.reciprocal %251 {approx = true} : vector<16x1xf32> -> vector<16x1xf32>
    %253 = vector.broadcast %252 : vector<16x1xf32> to vector<16x16xf32>
    %254 = arith.mulf %247, %253 : vector<16x16xf32>
    %255 = arith.truncf %254 : vector<16x16xf32> to vector<16x16xbf16>
    %cst_71 = arith.constant dense<0.000000e+00> : vector<16x16xf32>
    %256 = tpu.matmul %255, %240, %cst_71 {dimension_numbers = #tpu.dot_dimension_numbers<[1], [0], [0], [1], [0, 0, 1, 1], [], []>} : vector<16x16xbf16>, vector<16x16xbf16>, vector<16x16xf32> -> vector<16x16xf32>
    %257 = tpu.concatenate %234, %256 in 1 : vector<16x16xf32>, vector<16x16xf32> -> vector<16x32xf32>
    %258 = arith.truncf %257 : vector<16x32xf32> to vector<16x32xbf16>
    %259 = vector.extract_strided_slice %204 {offsets = [0, 96], sizes = [32, 32], strides = [1, 1]} : vector<128x128xbf16> to vector<32x32xbf16>
    %cst_72 = arith.constant dense<0.000000e+00> : vector<16x32xf32>
    %260 = tpu.matmul %258, %259, %cst_72 {dimension_numbers = #tpu.dot_dimension_numbers<[1], [0], [0], [1], [0, 0, 1, 1], [], []>} : vector<16x32xbf16>, vector<32x32xbf16>, vector<16x32xf32> -> vector<16x32xf32>
    %261 = vector.extract_strided_slice %206 {offsets = [1, 0], sizes = [1, 32], strides = [1, 1]} : vector<8x128xf32> to vector<1x32xf32>
    %262 = vector.broadcast %261 : vector<1x32xf32> to vector<16x32xf32>
    %263 = arith.addf %260, %262 : vector<16x32xf32>
    %264 = arith.addf %202, %263 : vector<16x32xf32>
    %265 = vector.extract_strided_slice %206 {offsets = [2, 0], sizes = [1, 32], strides = [1, 1]} : vector<8x128xf32> to vector<1x32xf32>
    %266 = vector.extract_strided_slice %206 {offsets = [3, 0], sizes = [1, 32], strides = [1, 1]} : vector<8x128xf32> to vector<1x32xf32>
    %cst_73 = arith.constant dense<0.000000e+00> : vector<16xf32>
    %267 = vector.multi_reduction <add>, %264, %cst_73 [1] : vector<16x32xf32> to vector<16xf32>
    %268 = vector.shape_cast %267 : vector<16xf32> to vector<16x1xf32>
    %cst_74 = arith.constant 3.200000e+01 : f32
    %269 = vector.broadcast %cst_74 : f32 to vector<16x1xf32>
    %270 = arith.divf %268, %269 : vector<16x1xf32>
    %271 = arith.mulf %264, %264 : vector<16x32xf32>
    %cst_75 = arith.constant dense<0.000000e+00> : vector<16xf32>
    %272 = vector.multi_reduction <add>, %271, %cst_75 [1] : vector<16x32xf32> to vector<16xf32>
    %273 = vector.shape_cast %272 : vector<16xf32> to vector<16x1xf32>
    %cst_76 = arith.constant 3.200000e+01 : f32
    %274 = vector.broadcast %cst_76 : f32 to vector<16x1xf32>
    %275 = arith.divf %273, %274 : vector<16x1xf32>
    %276 = arith.mulf %270, %270 : vector<16x1xf32>
    %277 = arith.subf %275, %276 : vector<16x1xf32>
    %cst_77 = arith.constant 0.000000e+00 : f32
    %278 = vector.broadcast %cst_77 : f32 to vector<16x1xf32>
    %279 = arith.maximumf %277, %278 : vector<16x1xf32>
    %280 = vector.broadcast %270 : vector<16x1xf32> to vector<16x32xf32>
    %281 = arith.subf %264, %280 : vector<16x32xf32>
    %cst_78 = arith.constant 9.99999996E-13 : f32
    %282 = vector.broadcast %cst_78 : f32 to vector<16x1xf32>
    %283 = arith.addf %279, %282 : vector<16x1xf32>
    %284 = math.rsqrt %283 : vector<16x1xf32>
    %285 = vector.broadcast %284 : vector<16x1xf32> to vector<16x32xf32>
    %286 = arith.mulf %281, %285 : vector<16x32xf32>
    %287 = vector.broadcast %265 : vector<1x32xf32> to vector<16x32xf32>
    %288 = arith.mulf %286, %287 : vector<16x32xf32>
    %289 = vector.broadcast %266 : vector<1x32xf32> to vector<16x32xf32>
    %290 = arith.addf %288, %289 : vector<16x32xf32>
    %291 = arith.truncf %290 : vector<16x32xf32> to vector<16x32xbf16>
    %292 = vector.extract_strided_slice %204 {offsets = [32, 0], sizes = [32, 64], strides = [1, 1]} : vector<128x128xbf16> to vector<32x64xbf16>
    %cst_79 = arith.constant dense<0.000000e+00> : vector<16x64xf32>
    %293 = tpu.matmul %291, %292, %cst_79 {dimension_numbers = #tpu.dot_dimension_numbers<[1], [0], [0], [1], [0, 0, 1, 1], [], []>} : vector<16x32xbf16>, vector<32x64xbf16>, vector<16x64xf32> -> vector<16x64xf32>
    %294 = vector.extract_strided_slice %206 {offsets = [4, 0], sizes = [1, 64], strides = [1, 1]} : vector<8x128xf32> to vector<1x64xf32>
    %295 = vector.broadcast %294 : vector<1x64xf32> to vector<16x64xf32>
    %296 = arith.addf %293, %295 : vector<16x64xf32>
    %297 = arith.mulf %296, %296 : vector<16x64xf32>
    %298 = arith.mulf %296, %297 : vector<16x64xf32>
    %cst_80 = arith.constant 4.471500e-02 : f32
    %299 = vector.broadcast %cst_80 : f32 to vector<16x64xf32>
    %300 = arith.mulf %299, %298 : vector<16x64xf32>
    %301 = arith.addf %296, %300 : vector<16x64xf32>
    %cst_81 = arith.constant 0.797884583 : f32
    %302 = vector.broadcast %cst_81 : f32 to vector<16x64xf32>
    %303 = arith.mulf %302, %301 : vector<16x64xf32>
    %304 = math.tanh %303 : vector<16x64xf32>
    %cst_82 = arith.constant 1.000000e+00 : f32
    %305 = vector.broadcast %cst_82 : f32 to vector<16x64xf32>
    %306 = arith.addf %305, %304 : vector<16x64xf32>
    %cst_83 = arith.constant 5.000000e-01 : f32
    %307 = vector.broadcast %cst_83 : f32 to vector<16x64xf32>
    %308 = arith.mulf %307, %306 : vector<16x64xf32>
    %309 = arith.mulf %296, %308 : vector<16x64xf32>
    %310 = arith.truncf %309 : vector<16x64xf32> to vector<16x64xbf16>
    %311 = vector.extract_strided_slice %204 {offsets = [64, 0], sizes = [64, 32], strides = [1, 1]} : vector<128x128xbf16> to vector<64x32xbf16>
    %cst_84 = arith.constant dense<0.000000e+00> : vector<16x32xf32>
    %312 = tpu.matmul %310, %311, %cst_84 {dimension_numbers = #tpu.dot_dimension_numbers<[1], [0], [0], [1], [0, 0, 1, 1], [], []>} : vector<16x64xbf16>, vector<64x32xbf16>, vector<16x32xf32> -> vector<16x32xf32>
    %313 = vector.extract_strided_slice %206 {offsets = [5, 0], sizes = [1, 32], strides = [1, 1]} : vector<8x128xf32> to vector<1x32xf32>
    %314 = vector.broadcast %313 : vector<1x32xf32> to vector<16x32xf32>
    %315 = arith.addf %312, %314 : vector<16x32xf32>
    %316 = arith.addf %290, %315 : vector<16x32xf32>
    %317 = vector.extract_strided_slice %206 {offsets = [6, 0], sizes = [1, 32], strides = [1, 1]} : vector<8x128xf32> to vector<1x32xf32>
    %318 = vector.extract_strided_slice %206 {offsets = [7, 0], sizes = [1, 32], strides = [1, 1]} : vector<8x128xf32> to vector<1x32xf32>
    %cst_85 = arith.constant dense<0.000000e+00> : vector<16xf32>
    %319 = vector.multi_reduction <add>, %316, %cst_85 [1] : vector<16x32xf32> to vector<16xf32>
    %320 = vector.shape_cast %319 : vector<16xf32> to vector<16x1xf32>
    %cst_86 = arith.constant 3.200000e+01 : f32
    %321 = vector.broadcast %cst_86 : f32 to vector<16x1xf32>
    %322 = arith.divf %320, %321 : vector<16x1xf32>
    %323 = arith.mulf %316, %316 : vector<16x32xf32>
    %cst_87 = arith.constant dense<0.000000e+00> : vector<16xf32>
    %324 = vector.multi_reduction <add>, %323, %cst_87 [1] : vector<16x32xf32> to vector<16xf32>
    %325 = vector.shape_cast %324 : vector<16xf32> to vector<16x1xf32>
    %cst_88 = arith.constant 3.200000e+01 : f32
    %326 = vector.broadcast %cst_88 : f32 to vector<16x1xf32>
    %327 = arith.divf %325, %326 : vector<16x1xf32>
    %328 = arith.mulf %322, %322 : vector<16x1xf32>
    %329 = arith.subf %327, %328 : vector<16x1xf32>
    %cst_89 = arith.constant 0.000000e+00 : f32
    %330 = vector.broadcast %cst_89 : f32 to vector<16x1xf32>
    %331 = arith.maximumf %329, %330 : vector<16x1xf32>
    %332 = vector.broadcast %322 : vector<16x1xf32> to vector<16x32xf32>
    %333 = arith.subf %316, %332 : vector<16x32xf32>
    %cst_90 = arith.constant 9.99999996E-13 : f32
    %334 = vector.broadcast %cst_90 : f32 to vector<16x1xf32>
    %335 = arith.addf %331, %334 : vector<16x1xf32>
    %336 = math.rsqrt %335 : vector<16x1xf32>
    %337 = vector.broadcast %336 : vector<16x1xf32> to vector<16x32xf32>
    %338 = arith.mulf %333, %337 : vector<16x32xf32>
    %339 = vector.broadcast %317 : vector<1x32xf32> to vector<16x32xf32>
    %340 = arith.mulf %338, %339 : vector<16x32xf32>
    %341 = vector.broadcast %318 : vector<1x32xf32> to vector<16x32xf32>
    %342 = arith.addf %340, %341 : vector<16x32xf32>
    %343 = tpu.iota {dimensions = array<i32: 1>} : vector<8x16xi32>
    %344 = tpu.iota {dimensions = array<i32: 0>} : vector<8x16xi32>
    %c8_i32 = arith.constant 8 : i32
    %345 = vector.broadcast %c8_i32 : i32 to vector<8x16xi32>
    %346 = arith.muli %344, %345 : vector<8x16xi32>
    %347 = arith.cmpi eq, %343, %346 : vector<8x16xi32>
    %348 = arith.extui %347 : vector<8x16xi1> to vector<8x16xi32>
    %349 = arith.sitofp %348 : vector<8x16xi32> to vector<8x16xf32>
    %cst_91 = arith.constant dense<0.000000e+00> : vector<8x32xf32>
    %350 = tpu.matmul %349, %342, %cst_91 {dimension_numbers = #tpu.dot_dimension_numbers<[1], [0], [0], [1], [0, 0, 1, 1], [], []>} : vector<8x16xf32>, vector<16x32xf32>, vector<8x32xf32> -> vector<8x32xf32>
    %351 = vector.extract_strided_slice %350 {offsets = [0, 0], sizes = [2, 32], strides = [1, 1]} : vector<8x32xf32> to vector<2x32xf32>
    %c0_92 = arith.constant 0 : index
    %c0_93 = arith.constant 0 : index
    %352 = vector.load %arg7[%c0_92, %c0_93] : memref<2x32xf32, #tpu.memory_space<vmem>>, vector<2x32xf32>
    tpu.vector_store %arg7[%c0_92, %c0_93], %351 {strides = array<i32>} : memref<2x32xf32, #tpu.memory_space<vmem>>, vector<2x32xf32>,
    return
  }
  func.func @transform_0(%arg0: i32) -> (i32, i32) {
    %c0_i32 = arith.constant 0 : i32
    %c0_i32_0 = arith.constant 0 : i32
    %c0_i32_1 = arith.constant 0 : i32
    return %c0_i32, %c0_i32_0 : i32, i32
  }
  func.func @transform_1(%arg0: i32) -> (i32, i32) {
    %c0_i32 = arith.constant 0 : i32
    %c0_i32_0 = arith.constant 0 : i32
    %c0_i32_1 = arith.constant 0 : i32
    return %c0_i32, %c0_i32_0 : i32, i32
  }
  func.func @transform_2(%arg0: i32) -> (i32, i32) {
    %c0_i32 = arith.constant 0 : i32
    %c0_i32_0 = arith.constant 0 : i32
    %c0_i32_1 = arith.constant 0 : i32
    return %c0_i32, %c0_i32_0 : i32, i32
  }
  func.func @transform_3(%arg0: i32) -> (i32, i32) {
    %c0_i32 = arith.constant 0 : i32
    %c0_i32_0 = arith.constant 0 : i32
    %c0_i32_1 = arith.constant 0 : i32
    return %c0_i32, %c0_i32_0 : i32, i32
  }
  func.func @transform_4(%arg0: i32) -> (i32, i32, i32) {
    %c0_i32 = arith.constant 0 : i32
    %c0_i32_0 = arith.constant 0 : i32
    %c0_i32_1 = arith.constant 0 : i32
    %c0_i32_2 = arith.constant 0 : i32
    return %c0_i32, %c0_i32_0, %c0_i32_1 : i32, i32, i32
  }
  func.func @transform_5(%arg0: i32) -> (i32, i32, i32) {
    %c0_i32 = arith.constant 0 : i32
    %c0_i32_0 = arith.constant 0 : i32
    %c0_i32_1 = arith.constant 0 : i32
    %c0_i32_2 = arith.constant 0 : i32
    return %c0_i32, %c0_i32_0, %c0_i32_1 : i32, i32, i32
  }
  func.func @transform_6(%arg0: i32) -> (i32, i32) {
    %c0_i32 = arith.constant 0 : i32
    %c0_i32_0 = arith.constant 0 : i32
    %c0_i32_1 = arith.constant 0 : i32
    return %c0_i32, %c0_i32_0 : i32, i32
  }
}

</mosaic_0001>

<bundles_post_ra>
// kernel: text_model_forward.1
= control target key start
LH: loop header
LB: loop body
LE: loop exit
PB: predicated region body
PF: predicated region fallthrough
CT: control target
= control target key end

     0   :  { %11 = vsyncpa [#allocation3], 0  ;;  %s1662_s0 = inlined_call_operand.vmem [shape: s32[16,2], index: 0, kind: input, shape index: {}]   ;;  %s1663_s1 = inlined_call_operand.vmem [shape: s32[1,16], index: 1, kind: input, shape index: {}]   ;;  %s1664_s2 = inlined_call_operand.vmem [shape: f32[80,32], index: 2, kind: input, shape index: {}]   ;;  %s1665_s3 = inlined_call_operand.vmem [shape: f32[2,32], index: 3, kind: input, shape index: {}]   ;;  %s1666_s4 = inlined_call_operand.hbm [shape: bf16[2,128,128], index: 4, kind: input, shape index: {}]   ;;  %s1667_s5 = inlined_call_operand.vmem [shape: f32[2,8,128], index: 5, kind: input, shape index: {}]   ;;  %s1668_s6 = inlined_call_operand.hbm [shape: f32[2,32], index: 6, kind: output, shape index: {}]  }
   0x1   :  { %12 = vsyncpa [#allocation4], 0  ;;  %s25_s23 = sshll.u32 %s1666_s4, 4  ;;  %s1356_s24 = smov [#allocation2]   ;;  %s26_s23 = int_to_ptr.hbm [resolvable:$true] %s25_s23 }
   0x2   :  { %s27_s25 = sshll.u32 %s1356_s24, 4  ;;  %s1357_s26 = smov 64   ;;  %s28_s25 = int_to_ptr.vmem [resolvable:$true] %s27_s25 }
   0x3   :  { %s1358_s27 = smov 4  }
   0x4   :  { %33 = dma.hbm_to_vmem [thread:$0]  %s26_s23, 2048, %s28_s25, [#allocation3], %s1357_s26, %s1357_s26, %s1358_s27  }
   0x5   :  { %1352 = dma.done.wait [#allocation3], 2048  }
   0x6   :  { %1353 = vsyncadd [#allocation3], 4294965248  ;;  %v1359_v0 = vmov 0   ;;  %v44_v1 = vld [vmem:[%s1662_s0 + $0x8] sm:$0xff]  ;;  %v43_v2 = vld [vmem:[%s1662_s0] sm:$0xff]  ;;  %v1360_v8 = vmov 1   ;;  %v41_v16 = vlaneseq }
   0x7   :  { %1228 = vset.pattern.permute.xlu1 %v1359_v0  ;;  %1226 = vset.pattern.permute.xlu0 %v1359_v0  ;;  %v89_v3 = vld [vmem:[%s1664_s2 + $0x48] sm:$0xff]  ;;  %v88_v4 = vld [vmem:[%s1664_s2 + $0x40] sm:$0xff]  ;;  %v87_v5 = vld [vmem:[%s1664_s2 + $0x38] sm:$0xff]  ;;  %v46_v6 = vadd.s32 64, %v44_v1  ;;  %v45_v7 = vadd.s32 64, %v43_v2  ;;  %vm90_vm4 = vcmask 654336  }
   0x8   :  { %58 = vperm.xlu1 %1228, %v44_v1   ;;  %55 = vperm.xlu0 %1226, %v43_v2   ;;  %v86_v9 = vld [vmem:[%s1664_s2 + $0x30] sm:$0xff]  ;;  %v85_v10 = vld [vmem:[%s1664_s2 + $0x28] sm:$0xff]  ;;  %v84_v11 = vld [vmem:[%s1664_s2 + $0x20] sm:$0xff]  ;;  %v1449_v19 = vshrl.u32 %v41_v16, 7  ;;  %v1455_v23 = vand.u32 127, %v41_v16  ;;  %v1361_v28 = vmov 0.0  }
   0x9   :  { %103 = vmatpush.msra.mxu0 %v89_v3  ;;  %v83_v12 = vld [vmem:[%s1664_s2 + $0x18] sm:$0xff]  ;;  %v82_v13 = vld [vmem:[%s1664_s2 + $0x10] sm:$0xff]  ;;  %v81_v14 = vld [vmem:[%s1664_s2 + $0x8] sm:$0xff]  ;;  %vm122_vm11 = vcmask 261120   ;;  %v1362_v39 = vmov 32.0   ;;  %s1364_s7 = smov 96  }
   0xa   :  { %v80_v15 = vld [vmem:[%s1664_s2] sm:$0xff]  ;;  %v50_v20 = vand.u32 7, %v1449_v19  ;;  %v1453_v21 = vadd.s32 8, %v1449_v19  ;;  %1242 = vrcp.f32 %v1362_v39  ;;  %v1474_v54 = vld [vmem:[#allocation2 + $0x8] sm:$0xff]  ;;  %s1367_s10 = smov 48   ;;  %s1368_s11 = smov 32  }
   0xb   :  { %104 = vmatpush.msra.mxu0 %v88_v4  ;;  %240 = vmatpush.bf16.msra.mxu1 %v1474_v54  ;;  %v1477_v56 = vld [vmem:[#allocation2] sm:$0xff]  ;;  %s1369_s12 = smov 16   ;;  %s1098_s16 = sshll.u32 %s1668_s6, 4  ;;  %s1099_s16 = int_to_ptr.hbm [resolvable:$true] %s1098_s16 }
   0xc   :  { %v52_v22 = vadd.s32 72, %v50_v20  ;;  %v51_v24 = vand.u32 7, %v1453_v21  ;;  %v191_v39 = vld [vmem:[%s1663_s1] sm:$0x1]  ;;  %s1366_s1 = smov 112  }
   0xd   :  { %105 = vmatpush.msra.mxu0 %v87_v5 }
   0xe   :  { %vm72_vm1 = vcmp.eq.s32.totalorder %v1455_v23, %v52_v22  ;;  %v53_v27 = vadd.s32 72, %v51_v24  ;;  %v1241_v24 = vld [vmem:[%s1665_s3 + $0x1] ss:$0 sm:$0xff] }
   0xf   :  { %106 = vmatpush.msra.mxu0 %v86_v9  ;;  %241 = vmatpush.bf16.msra.mxu1 %v1477_v56 }
  0x10   :  { %1229 = vset.pattern.permute.xlu1 %v1360_v8  ;;  %1227 = vset.pattern.permute.xlu0 %v1360_v8  ;;  %vm73_vm8 = vcmp.eq.s32.totalorder %v1455_v23, %v53_v27  ;;  %v1243_v40 = vpop.eup %1242 }
  0x11   :  { %66 = vperm.xlu1 %1229, %v46_v6   ;;  %63 = vperm.xlu0 %1227, %v45_v7   ;;  %v130_v41 = vmul.f32 32.0, %v1243_v40  ;;  %vm134_vm12 = vweird.f32 %v1243_v40 }
  0x12   :  { %107 = vmatpush.msra.mxu0 %v85_v10 }
  0x13   :  { %v131_v42 = vsub.f32 1.0, %v130_v41 }
  0x14   :  { %108 = vmatpush.msra.mxu0 %v84_v11 }
  0x15   :  { %v132_v43 = vmul.f32 %v1243_v40, %v131_v42  ;;  %v186_v42 = vshra.s32 %v1449_v19, 3 }
  0x16   :  { %109 = vmatpush.msra.mxu0 %v83_v12 }
  0x17   :  { %v133_v44 = vadd.f32 %v1243_v40, %v132_v43  ;;  %v188_v43 = vshra.s32 %v1455_v23, 3 }
  0x18   :  { %110 = vmatpush.msra.mxu0 %v82_v13 }
  0x19   :  { %v1470_v45 = vsel %vm134_vm12, %v1243_v40, %v133_v44  ;;  %v187_v44 = vshra.s32 %v1453_v21, 3 }
  0x1a   :  { %111 = vmatpush.msra.mxu0 %v81_v14 }
  0x1c   :  { %112 = vmatpush.msra.mxu0 %v80_v15  ;;  %v1240_v15 = vld [vmem:[%s1665_s3] ss:$0 sm:$0xff]  ;;  %s1363_s3 = smov 80  }
  0x7a   :  { %v56_v17 = vpop.permute.xlu0 %55  ;;  %v59_v18 = vpop.permute.xlu1 %58 }
  0x7b   :  { %vm60_vm2 = vcmp.eq.s32.totalorder %v1455_v23, %v56_v17  ;;  %vm61_vm5 = vcmp.eq.s32.totalorder %v1455_v23, %v59_v18 }
  0x83   :  { %v64_v25 = vpop.permute.xlu0 %63  ;;  %v67_v26 = vpop.permute.xlu1 %66 }
  0x84   :  { %vm68_vm0 = vcmp.eq.s32.totalorder %v1455_v23, %v64_v25  ;;  %vm69_vm6 = vcmp.eq.s32.totalorder %v1455_v23, %v67_v26 }
  0x85   :  { %vm70_vm3 = vmor %vm60_vm2, %vm68_vm0 }
  0x86   :  { %vm74_vm7 = vmor %vm70_vm3, %vm72_vm1  ;;  %vm252_vm3 = vcmask 130048  }
  0x87   :  { %v1108_v29 = vsel %vm74_vm7, 1.0, %v1361_v28  ;;  %vm71_vm9 = vmor %vm61_vm5, %vm69_vm6  ;;  %vm189_vm6 = vcmp.eq.s32.totalorder %v186_v42, %v188_v43 }
  0x88   :  { %1110 = vmatmul.msk.f32.vlgmr.msra.gmra.mxu0 %vm90_vm4, %v1108_v29  ;;  %vm75_vm10 = vmor %vm71_vm9, %vm73_vm8  ;;  %vm190_vm8 = vcmp.eq.s32.totalorder %v187_v44, %v188_v43 }
  0x89   :  { %v1109_v30 = vsel %vm75_vm10, 1.0, %v1361_v28 }
  0x90   :  { %1111 = vmatmul.msk.f32.gmra.mxu0 %vm90_vm4, %v1109_v30  ;;  %vm192_vm4 = vcmp.ne.s32.totalorder %v191_v39, 0 }
  0x91   :  { %v193_v40 = vsel %vm192_vm4, 1, %v1359_v0 }
  0x92   :  { %v194_v41 = vperm.slane %v193_v40, 0 }
  0x94   :  { %vm195_vm5 = vcmp.eq.s32.totalorder %v194_v41, 1 }
  0x95   :  { %vm196_vm7 = vmand %vm189_vm6, %vm195_vm5 }
  0x96   :  { %vm197_vm9 = vmand %vm190_vm8, %vm195_vm5 }
 0x105   :  { %v114_v31 = vpop.f32.mrf.mxu0 }
 0x106   :  { %v123_v32 = vsel %vm122_vm11, %v114_v31, 0.0  ;;  %v138_v33 = vmul.f32 %v114_v31, %v114_v31 }
 0x107   :  { %124 = vadd.xlane.f32.xlu2 %v123_v32 }
 0x108   :  { %v140_v34 = vsel %vm122_vm11, %v138_v33, 0.0 }
 0x109   :  { %141 = vadd.xlane.f32.xlu1 %v140_v34 }
 0x10d   :  { %v117_v35 = vpop.f32.mrf.mxu0 }
 0x10e   :  { %v126_v36 = vsel %vm122_vm11, %v117_v35, 0.0  ;;  %v139_v37 = vmul.f32 %v117_v35, %v117_v35 }
 0x10f   :  { %127 = vadd.xlane.f32.xlu2 %v126_v36 }
 0x110   :  { %v143_v38 = vsel %vm122_vm11, %v139_v37, 0.0 }
 0x117   :  { %144 = vadd.xlane.f32.xlu2 %v143_v38 }
 0x17a   :  { %v125_v46 = vpop.xlane.xlu2 %124 }
 0x17b   :  { %v136_v47 = vmul.f32 %v1470_v45, %v125_v46  ;;  %v1365_v46 = vmov -1e+09  }
 0x17c   :  { %v142_v48 = vpop.xlane.xlu1 %141  ;;  %v1521_v0 = vsel %vm197_vm9, 0.0, %v1365_v46 }
 0x17d   :  { %v148_v49 = vmul.f32 %v136_v47, %v136_v47  ;;  %v146_v50 = vmul.f32 %v142_v48, %v1470_v45  ;;  %v154_v12 = vsub.f32 %v114_v31, %v136_v47  ;;  %v1498_v31 = vld [vmem:[%s1667_s5] sm:$0xff]  ;;  %v1517_v47 = vsel %vm196_vm7, 0.0, %v1365_v46 }
 0x17e   :  { %v218_v32 = vperm.slane %v1498_v31, 0 }
 0x17f   :  { %v150_v51 = vsub.f32 %v146_v50, %v148_v49 }
 0x181   :  { %v152_v52 = vmax.f32 %v150_v51, 0.0 }
 0x182   :  { %v128_v53 = vpop.xlane.xlu2 %127 }
 0x183   :  { %v156_v55 = vadd.f32 1e-12, %v152_v52  ;;  %v137_v57 = vmul.f32 %v1470_v45, %v128_v53 }
 0x185   :  { %1244 = vrsqrt.f32 %v156_v55  ;;  %v149_v60 = vmul.f32 %v137_v57, %v137_v57  ;;  %vm164_vm14 = vweird.f32 %v156_v55  ;;  %v155_v17 = vsub.f32 %v117_v35, %v137_v57 }
 0x18a   :  { %v145_v58 = vpop.xlane.xlu2 %144 }
 0x18b   :  { %v1245_v59 = vpop.eup %1244  ;;  %v147_v61 = vmul.f32 %v145_v58, %v1470_v45 }
 0x18c   :  { %v159_v62 = vmul.f32 %v1245_v59, %v156_v55  ;;  %vm165_vm13 = vweird.f32 %v1245_v59 }
 0x18d   :  { %v151_v63 = vsub.f32 %v147_v61, %v149_v60  ;;  %vm166_vm15 = vmor %vm164_vm14, %vm165_vm13 }
 0x18e   :  { %v160_v1 = vmul.f32 %v1245_v59, %v159_v62 }
 0x18f   :  { %v153_v2 = vmax.f32 %v151_v63, 0.0 }
 0x190   :  { %v161_v4 = vmul.f32 0.5, %v160_v1 }
 0x191   :  { %v157_v3 = vadd.f32 1e-12, %v153_v2 }
 0x192   :  { %v162_v5 = vsub.f32 1.5, %v161_v4 }
 0x193   :  { %1246 = vrsqrt.f32 %v157_v3  ;;  %vm174_vm1 = vweird.f32 %v157_v3 }
 0x194   :  { %v163_v7 = vmul.f32 %v1245_v59, %v162_v5 }
 0x196   :  { %v167_v11 = vsel %vm166_vm15, %v1245_v59, %v163_v7 }
 0x197   :  { %v178_v14 = vmul.f32 %v167_v11, %v154_v12 }
 0x199   :  { %v1247_v6 = vpop.eup %1246  ;;  %v181_v22 = vmul.f32 %v1240_v15, %v178_v14 }
 0x19a   :  { %v169_v8 = vmul.f32 %v1247_v6, %v157_v3  ;;  %vm175_vm0 = vweird.f32 %v1247_v6 }
 0x19b   :  { %vm176_vm2 = vmor %vm174_vm1, %vm175_vm0  ;;  %v1488_v26 = vadd.f32 %v1241_v24, %v181_v22  ;;  %vm555_vm1 = vcmask 523264  }
 0x19c   :  { %v170_v9 = vmul.f32 %v1247_v6, %v169_v8 }
 0x19e   :  { %v171_v10 = vmul.f32 0.5, %v170_v9 }
 0x1a0   :  { %v172_v13 = vsub.f32 1.5, %v171_v10 }
 0x1a2   :  { %v173_v16 = vmul.f32 %v1247_v6, %v172_v13 }
 0x1a4   :  { %v177_v18 = vsel %vm176_vm2, %v1247_v6, %v173_v16 }
 0x1a5   :  { %v179_v20 = vmul.f32 %v177_v18, %v155_v17 }
 0x1a7   :  { %v182_v25 = vmul.f32 %v1240_v15, %v179_v20 }
 0x1a9   :  { %v1490_v27 = vadd.f32 %v1241_v24, %v182_v25 }
 0x1ab   :  { %v217_v29 = vpack.c.bf16 %v1490_v27, %v1488_v26 }
 0x1ad   :  { %1120 = vmatmul.msk.bf16.vlgmr.msra.gmra.mxu1 %vm122_vm11, %v217_v29 }
 0x22a   :  { %v243_v30 = vpop.f32.mrf.mxu1 }
 0x22b   :  { %v244_v34 = vadd.f32 %v243_v30, %v218_v32 }
 0x232   :  { %v245_v33 = vpop.f32.mrf.mxu1 }
 0x233   :  { %v246_v35 = vadd.f32 %v245_v33, %v218_v32 }
 0x235   :  { %v1501_v36 = vpack.c.bf16 %v246_v35, %v244_v34 }
 0x237   :  { %320 = vrot.lane.b32.xlu1 %v1501_v36, %s1363_s3  ;;  %250 = vrot.lane.b32.xlu0 %v1501_v36, %s1364_s7 }
 0x2a9   :  { %v251_v37 = vpop.permute.xlu0 %250  ;;  %v321_v58 = vpop.permute.xlu1 %320 }
 0x2aa   :  { %v257_v38 = vsel %vm252_vm3, %v251_v37, 0  ;;  %v326_v62 = vsel %vm252_vm3, %v321_v58, 0 }
 0x2ab   :  { %266 = vmatpush.bf16.xpose.msra.mxu2 %v257_v38 }
 0x2b2   :  { %1121 = vmatmul.msk.bf16.vlgmr.msra.gmra.mxu2 %vm252_vm3, %v1501_v36 }
 0x335   :  { %v268_v48 = vpop.f32.mrf.mxu2 }
 0x336   :  { %v269_v49 = vadd.f32 %v268_v48, %v1517_v47 }
 0x338   :  { %v273_v50 = vsel %vm252_vm3, %v269_v49, -inf }
 0x339   :  { %274 = vmax.xlane.f32.xlu2 %v273_v50 }
 0x33d   :  { %v270_v51 = vpop.f32.mrf.mxu2 }
 0x33e   :  { %v271_v52 = vadd.f32 %v270_v51, %v1521_v0 }
 0x340   :  { %v276_v53 = vsel %vm252_vm3, %v271_v52, -inf }
 0x341   :  { %277 = vmax.xlane.f32.xlu0 %v276_v53 }
 0x351   :  { %298 = vrot.lane.b32.xlu2 %v1501_v36, %s1357_s26 }
 0x3ac   :  { %v275_v21 = vpop.xlane.xlu2 %274 }
 0x3ad   :  { %v279_v55 = vsub.f32 %v269_v49, %v275_v21 }
 0x3af   :  { %v281_v57 = vmul.f32 1.442695, %v279_v55 }
 0x3b1   :  { %1248 = vpow2.f32 %v281_v57 }
 0x3b4   :  { %v278_v59 = vpop.xlane.xlu0 %277  ;;  %v299_v60 = vpop.permute.xlu2 %298 }
 0x3b5   :  { %v280_v61 = vsub.f32 %v271_v52, %v278_v59  ;;  %311 = vmatpush.bf16.msra.mxu3 %v299_v60 }
 0x3b7   :  { %v1249_v63 = vpop.eup %1248  ;;  %v283_v1 = vmul.f32 1.442695, %v280_v61 }
 0x3b8   :  { %v285_v2 = vsel %vm252_vm3, %v1249_v63, 0.0 }
 0x3b9   :  { %335 = vmatpush.bf16.xpose.msrb.mxu3 %v326_v62  ;;  %1250 = vpow2.f32 %v283_v1  ;;  %286 = vadd.xlane.f32.xlu2 %v285_v2  ;;  %v398_v62 = vperm.slane %v1498_v31, 1 }
 0x3bf   :  { %v1251_v3 = vpop.eup %1250 }
 0x3c0   :  { %v288_v4 = vsel %vm252_vm3, %v1251_v3, 0.0 }
 0x3c1   :  { %289 = vadd.xlane.f32.xlu2 %v288_v4 }
 0x3d9   :  { %318 = vrot.lane.b32.xlu2 %v1501_v36, %s1366_s1 }
 0x42c   :  { %v287_v5 = vpop.xlane.xlu2 %286 }
 0x42d   :  { %v291_v6 = vmax.f32 %v287_v5, 1e-30 }
 0x42f   :  { %1252 = vrcp.f32 %v291_v6 }
 0x434   :  { %v290_v7 = vpop.xlane.xlu2 %289 }
 0x435   :  { %v292_v8 = vmax.f32 %v290_v7, 1e-30  ;;  %v1253_v9 = vpop.eup %1252 }
 0x436   :  { %v295_v11 = vmul.f32 %v1253_v9, %v1249_v63 }
 0x437   :  { %1254 = vrcp.f32 %v292_v8 }
 0x43c   :  { %v319_v14 = vpop.permute.xlu2 %318 }
 0x43d   :  { %v1255_v10 = vpop.eup %1254 }
 0x43e   :  { %v296_v12 = vmul.f32 %v1255_v10, %v1251_v3 }
 0x440   :  { %v297_v13 = vpack.c.bf16 %v296_v12, %v295_v11 }
 0x442   :  { %1122 = vmatmul.msk.bf16.vlgmr.msra.gmra.mxu3 %vm252_vm3, %v297_v13 }
 0x452   :  { %1123 = vmatmul.msk.bf16.vlgmr.msrb.gmra.mxu3 %vm252_vm3, %v319_v14 }
 0x4c5   :  { %v313_v15 = vpop.f32.mrf.mxu3 }
 0x4cd   :  { %v315_v16 = vpop.f32.mrf.mxu3 }
 0x4d5   :  { %v337_v17 = vpop.f32.mrf.mxu3 }
 0x4d6   :  { %v338_v18 = vadd.f32 %v337_v17, %v1517_v47  ;;  %v1198_v17 = vld [vmem:[#allocation2 + $0x18] sm:$0xff] }
 0x4d7   :  { %503 = vmatpush.bf16.msrb.mxu0 %v1198_v17 }
 0x4d8   :  { %v342_v20 = vsel %vm252_vm3, %v338_v18, -inf }
 0x4d9   :  { %343 = vmax.xlane.f32.xlu0 %v342_v20 }
 0x4dd   :  { %v339_v22 = vpop.f32.mrf.mxu3 }
 0x4de   :  { %v340_v24 = vadd.f32 %v339_v22, %v1521_v0 }
 0x4e0   :  { %v345_v25 = vsel %vm252_vm3, %v340_v24, -inf }
 0x4e1   :  { %346 = vmax.xlane.f32.xlu2 %v345_v25 }
 0x4f9   :  { %399 = vrot.lane.b32.xlu2 %v1477_v56, %s1368_s11 }
 0x54c   :  { %v344_v29 = vpop.xlane.xlu0 %343 }
 0x54d   :  { %v348_v30 = vsub.f32 %v338_v18, %v344_v29  ;;  %v1197_v18 = vld [vmem:[#allocation2 + $0x10] sm:$0xff] }
 0x54e   :  { %504 = vmatpush.bf16.msrb.mxu0 %v1197_v18 }
 0x54f   :  { %v350_v32 = vmul.f32 1.442695, %v348_v30 }
 0x551   :  { %1256 = vpow2.f32 %v350_v32 }
 0x554   :  { %v347_v33 = vpop.xlane.xlu2 %346 }
 0x555   :  { %v349_v34 = vsub.f32 %v340_v24, %v347_v33 }
 0x557   :  { %v1257_v35 = vpop.eup %1256  ;;  %v352_v37 = vmul.f32 1.442695, %v349_v34 }
 0x558   :  { %v354_v38 = vsel %vm252_vm3, %v1257_v35, 0.0 }
 0x559   :  { %1258 = vpow2.f32 %v352_v37  ;;  %355 = vadd.xlane.f32.xlu0 %v354_v38 }
 0x55c   :  { %v400_v57 = vpop.permute.xlu2 %399 }
 0x55f   :  { %v1259_v39 = vpop.eup %1258 }
 0x560   :  { %v357_v40 = vsel %vm252_vm3, %v1259_v39, 0.0 }
 0x561   :  { %358 = vadd.xlane.f32.xlu1 %v357_v40 }
 0x56d   :  { %367 = vrot.lane.b32.xlu0 %v1501_v36, %s1367_s10 }
 0x575   :  { %401 = vrot.lane.b32.xlu0 %v1474_v54, %s1368_s11 }
 0x5cc   :  { %v356_v41 = vpop.xlane.xlu0 %355 }
 0x5cd   :  { %v360_v42 = vmax.f32 %v356_v41, 1e-30 }
 0x5cf   :  { %1260 = vrcp.f32 %v360_v42 }
 0x5d4   :  { %v359_v43 = vpop.xlane.xlu1 %358 }
 0x5d5   :  { %v361_v44 = vmax.f32 %v359_v43, 1e-30  ;;  %v1261_v46 = vpop.eup %1260 }
 0x5d6   :  { %v364_v49 = vmul.f32 %v1261_v46, %v1257_v35 }
 0x5d7   :  { %1262 = vrcp.f32 %v361_v44 }
 0x5dd   :  { %v1263_v48 = vpop.eup %1262 }
 0x5de   :  { %v365_v50 = vmul.f32 %v1263_v48, %v1259_v39 }
 0x5df   :  { %v368_v51 = vpop.permute.xlu0 %367 }
 0x5e0   :  { %380 = vmatpush.bf16.msrb.mxu1 %v368_v51  ;;  %v366_v52 = vpack.c.bf16 %v365_v50, %v364_v49 }
 0x5e3   :  { %1124 = vmatmul.msk.bf16.vlgmr.msrb.gmra.mxu1 %vm252_vm3, %v366_v52  ;;  %v474_v52 = vperm.slane %v1498_v31, 2 }
 0x5e7   :  { %v402_v36 = vpop.permute.xlu0 %401 }
 0x5e8   :  { %414 = vmatpush.bf16.msrb.mxu2 %v402_v36 }
 0x5ec   :  { %415 = vmatpush.bf16.msrb.mxu2 %v400_v57 }
 0x660   :  { %v382_v53 = vpop.f32.mrf.mxu1 }
 0x668   :  { %v384_v21 = vpop.f32.mrf.mxu1 }
 0x669   :  { %v1230_v55 = vpack.i.bf16 %v384_v21, %v382_v53 }
 0x66b   :  { %1231 = vrot.lane.b32.xlu0 %v1230_v55, %s1369_s12 }
 0x6dd   :  { %v1232_v58 = vpop.permute.xlu0 %1231 }
 0x6de   :  { %v1234_v59 = vunpack.i.h.bf16 %v1232_v58  ;;  %v1233_v60 = vunpack.i.l.bf16 %v1232_v58  ;;  %v477_v58 = vperm.slane %v1498_v31, 3 }
 0x6e0   :  { %v396_v54 = vsel %vm252_vm3, %v315_v16, %v1234_v59  ;;  %v395_v61 = vsel %vm252_vm3, %v313_v15, %v1233_v60 }
 0x6e1   :  { %v397_v56 = vpack.c.bf16 %v396_v54, %v395_v61 }
 0x6e3   :  { %1125 = vmatmul.msk.bf16.vlgmr.msrb.gmra.mxu2 %vm122_vm11, %v397_v56  ;;  %v1202_v56 = vld [vmem:[#allocation2 + $0x38] sm:$0xff] }
 0x6e4   :  { %563 = vmatpush.bf16.msra.mxu3 %v1202_v56 }
 0x766   :  { %v417_v63 = vpop.f32.mrf.mxu2 }
 0x767   :  { %v418_v1 = vadd.f32 %v417_v63, %v398_v62  ;;  %v1200_v63 = vld [vmem:[#allocation2 + $0x28] sm:$0xff] }
 0x769   :  { %v422_v2 = vadd.f32 %v418_v1, %v1488_v26  ;;  %v481_v1 = vperm.slane %v1498_v31, 4 }
 0x76b   :  { %v424_v3 = vsel %vm122_vm11, %v422_v2, 0.0  ;;  %v432_v6 = vmul.f32 %v422_v2, %v422_v2 }
 0x76c   :  { %425 = vadd.xlane.f32.xlu1 %v424_v3 }
 0x76d   :  { %v434_v9 = vsel %vm122_vm11, %v432_v6, 0.0 }
 0x76e   :  { %v419_v4 = vpop.f32.mrf.mxu2 }
 0x76f   :  { %v420_v5 = vadd.f32 %v419_v4, %v398_v62  ;;  %v1201_v62 = vld [vmem:[#allocation2 + $0x30] sm:$0xff] }
 0x770   :  { %564 = vmatpush.bf16.msra.mxu3 %v1201_v62 }
 0x771   :  { %v423_v7 = vadd.f32 %v420_v5, %v1490_v27 }
 0x773   :  { %v427_v8 = vsel %vm122_vm11, %v423_v7, 0.0  ;;  %v433_v10 = vmul.f32 %v423_v7, %v423_v7 }
 0x774   :  { %428 = vadd.xlane.f32.xlu0 %v427_v8  ;;  %435 = vadd.xlane.f32.xlu1 %v434_v9 }
 0x775   :  { %v437_v11 = vsel %vm122_vm11, %v433_v10, 0.0  ;;  %565 = vmatpush.bf16.msra.mxu3 %v1200_v63 }
 0x77c   :  { %438 = vadd.xlane.f32.xlu1 %v437_v11 }
 0x7df   :  { %v426_v12 = vpop.xlane.xlu1 %425 }
 0x7e0   :  { %v430_v26 = vmul.f32 %v426_v12, %v1470_v45 }
 0x7e2   :  { %v442_v14 = vmul.f32 %v430_v26, %v430_v26  ;;  %v448_v49 = vsub.f32 %v422_v2, %v430_v26  ;;  %v1199_v2 = vld [vmem:[#allocation2 + $0x20] sm:$0xff] }
 0x7e3   :  { %566 = vmatpush.bf16.msra.mxu3 %v1199_v2 }
 0x7e7   :  { %v436_v13 = vpop.xlane.xlu1 %435  ;;  %v429_v16 = vpop.xlane.xlu0 %428 }
 0x7e8   :  { %v440_v15 = vmul.f32 %v436_v13, %v1470_v45  ;;  %v431_v20 = vmul.f32 %v429_v16, %v1470_v45 }
 0x7ea   :  { %v444_v27 = vsub.f32 %v440_v15, %v442_v14  ;;  %v443_v29 = vmul.f32 %v431_v20, %v431_v20  ;;  %v449_v53 = vsub.f32 %v423_v7, %v431_v20 }
 0x7ec   :  { %v446_v22 = vmax.f32 %v444_v27, 0.0 }
 0x7ee   :  { %v450_v24 = vadd.f32 1e-12, %v446_v22 }
 0x7ef   :  { %v439_v25 = vpop.xlane.xlu1 %438 }
 0x7f0   :  { %1264 = vrsqrt.f32 %v450_v24  ;;  %v441_v30 = vmul.f32 %v439_v25, %v1470_v45  ;;  %vm458_vm12 = vweird.f32 %v450_v24 }
 0x7f2   :  { %v445_v32 = vsub.f32 %v441_v30, %v443_v29  ;;  %v530_v30 = vperm.slane %v1498_v31, 5 }
 0x7f4   :  { %v447_v33 = vmax.f32 %v445_v32, 0.0 }
 0x7f6   :  { %v1265_v34 = vpop.eup %1264  ;;  %v451_v35 = vadd.f32 1e-12, %v447_v33 }
 0x7f7   :  { %v453_v37 = vmul.f32 %v1265_v34, %v450_v24  ;;  %vm459_vm10 = vweird.f32 %v1265_v34 }
 0x7f8   :  { %1266 = vrsqrt.f32 %v451_v35  ;;  %vm460_vm13 = vmor %vm458_vm12, %vm459_vm10  ;;  %vm468_vm15 = vweird.f32 %v451_v35 }
 0x7f9   :  { %v454_v38 = vmul.f32 %v1265_v34, %v453_v37 }
 0x7fb   :  { %v455_v39 = vmul.f32 0.5, %v454_v38 }
 0x7fd   :  { %v456_v40 = vsub.f32 1.5, %v455_v39 }
 0x7fe   :  { %v1267_v41 = vpop.eup %1266 }
 0x7ff   :  { %v457_v42 = vmul.f32 %v1265_v34, %v456_v40  ;;  %v463_v43 = vmul.f32 %v1267_v41, %v451_v35  ;;  %vm469_vm14 = vweird.f32 %v1267_v41 }
 0x800   :  { %vm470_vm0 = vmor %vm468_vm15, %vm469_vm14 }
 0x801   :  { %v464_v44 = vmul.f32 %v1267_v41, %v463_v43  ;;  %v461_v46 = vsel %vm460_vm13, %v1265_v34, %v457_v42 }
 0x802   :  { %v472_v51 = vmul.f32 %v461_v46, %v448_v49 }
 0x803   :  { %v465_v48 = vmul.f32 0.5, %v464_v44 }
 0x804   :  { %v475_v57 = vmul.f32 %v474_v52, %v472_v51 }
 0x805   :  { %v466_v50 = vsub.f32 1.5, %v465_v48 }
 0x806   :  { %v478_v60 = vadd.f32 %v477_v58, %v475_v57 }
 0x807   :  { %v467_v36 = vmul.f32 %v1267_v41, %v466_v50 }
 0x809   :  { %v471_v21 = vsel %vm470_vm0, %v1267_v41, %v467_v36 }
 0x80a   :  { %v473_v55 = vmul.f32 %v471_v21, %v449_v53 }
 0x80c   :  { %v476_v59 = vmul.f32 %v474_v52, %v473_v55  ;;  %v1574_v55 = vld [vmem:[#allocation2 + $0x48] sm:$0xff] }
 0x80d   :  { %673 = vmatpush.bf16.msra.mxu1 %v1574_v55 }
 0x80e   :  { %v479_v54 = vadd.f32 %v477_v58, %v476_v59  ;;  %v1578_v58 = vld [vmem:[#allocation2 + $0x40] sm:$0xff] }
 0x810   :  { %v480_v61 = vpack.c.bf16 %v479_v54, %v478_v60 }
 0x811   :  { %674 = vmatpush.bf16.msra.mxu1 %v1578_v58 }
 0x812   :  { %1134 = vmatmul.msk.bf16.vlgmr.msrb.gmra.mxu0 %vm122_vm11, %v480_v61 }
 0x88f   :  { %v506_v3 = vpop.f32.mrf.mxu0 }
 0x890   :  { %v507_v4 = vadd.f32 %v506_v3, %v481_v1 }
 0x892   :  { %v511_v5 = vmul.f32 %v507_v4, %v507_v4 }
 0x894   :  { %v513_v6 = vmul.f32 %v511_v5, %v507_v4 }
 0x896   :  { %v515_v7 = vmul.f32 0.044715, %v513_v6 }
 0x897   :  { %v508_v8 = vpop.f32.mrf.mxu0 }
 0x898   :  { %v517_v9 = vadd.f32 %v515_v7, %v507_v4  ;;  %v509_v10 = vadd.f32 %v508_v8, %v481_v1 }
 0x89a   :  { %v519_v11 = vmul.f32 0.7978846, %v517_v9  ;;  %v512_v12 = vmul.f32 %v509_v10, %v509_v10 }
 0x89c   :  { %v514_v26 = vmul.f32 %v512_v12, %v509_v10  ;;  %1268 = vtanh.f32 %v519_v11 }
 0x89e   :  { %v516_v13 = vmul.f32 0.044715, %v514_v26  ;;  %v625_v26 = vperm.slane %v1498_v31, 6 }
 0x8a0   :  { %v518_v14 = vadd.f32 %v516_v13, %v509_v10 }
 0x8a2   :  { %v520_v15 = vmul.f32 0.7978846, %v518_v14  ;;  %v1269_v16 = vpop.eup %1268 }
 0x8a3   :  { %v523_v17 = vadd.f32 1.0, %v1269_v16 }
 0x8a4   :  { %1270 = vtanh.f32 %v520_v15 }
 0x8a5   :  { %v525_v18 = vmul.f32 0.5, %v523_v17 }
 0x8a7   :  { %v527_v24 = vmul.f32 %v525_v18, %v507_v4  ;;  %v628_v18 = vperm.slane %v1498_v31, 7 }
 0x8aa   :  { %v1271_v27 = vpop.eup %1270 }
 0x8ab   :  { %v524_v20 = vadd.f32 1.0, %v1271_v27 }
 0x8ad   :  { %v526_v22 = vmul.f32 0.5, %v524_v20 }
 0x8af   :  { %v528_v25 = vmul.f32 %v526_v22, %v509_v10 }
 0x8b1   :  { %v529_v29 = vpack.c.bf16 %v528_v25, %v527_v24 }
 0x8b3   :  { %1151 = vmatmul.msk.bf16.vlgmr.msra.gmra.mxu3 %vm555_vm1, %v529_v29 }
 0x936   :  { %v568_v32 = vpop.f32.mrf.mxu3 }
 0x937   :  { %v569_v33 = vadd.f32 %v568_v32, %v530_v30 }
 0x939   :  { %v573_v34 = vadd.f32 %v569_v33, %v478_v60 }
 0x93b   :  { %v575_v35 = vsel %vm122_vm11, %v573_v34, 0.0  ;;  %v583_v37 = vmul.f32 %v573_v34, %v573_v34 }
 0x93c   :  { %576 = vadd.xlane.f32.xlu2 %v575_v35 }
 0x93d   :  { %v585_v38 = vsel %vm122_vm11, %v583_v37, 0.0 }
 0x93e   :  { %v570_v39 = vpop.f32.mrf.mxu3  ;;  %586 = vadd.xlane.f32.xlu1 %v585_v38 }
 0x93f   :  { %v571_v40 = vadd.f32 %v570_v39, %v530_v30  ;;  %v1594_v30 = vld [vmem:[%s1667_s5 + $0x8] sm:$0xff]  ;;  %s1370_s5 = smov [#allocation5]  }
 0x940   :  { %v651_v32 = vperm.slane %v1594_v30, 0 }
 0x941   :  { %v574_v41 = vadd.f32 %v571_v40, %v479_v54 }
 0x943   :  { %v578_v42 = vsel %vm122_vm11, %v574_v41, 0.0  ;;  %v584_v43 = vmul.f32 %v574_v41, %v574_v41 }
 0x945   :  { %v588_v44 = vsel %vm122_vm11, %v584_v43, 0.0 }
 0x946   :  { %579 = vadd.xlane.f32.xlu1 %v578_v42 }
 0x94e   :  { %589 = vadd.xlane.f32.xlu1 %v588_v44 }
 0x9af   :  { %v577_v46 = vpop.xlane.xlu2 %576 }
 0x9b0   :  { %v581_v48 = vmul.f32 %v577_v46, %v1470_v45 }
 0x9b1   :  { %v587_v49 = vpop.xlane.xlu1 %586 }
 0x9b2   :  { %v593_v50 = vmul.f32 %v581_v48, %v581_v48  ;;  %v591_v51 = vmul.f32 %v587_v49, %v1470_v45  ;;  %v599_v11 = vsub.f32 %v573_v34, %v581_v48 }
 0x9b4   :  { %v595_v52 = vsub.f32 %v591_v51, %v593_v50 }
 0x9b6   :  { %v597_v36 = vmax.f32 %v595_v52, 0.0 }
 0x9b8   :  { %v601_v53 = vadd.f32 1e-12, %v597_v36 }
 0x9b9   :  { %v580_v21 = vpop.xlane.xlu1 %579 }
 0x9ba   :  { %1272 = vrsqrt.f32 %v601_v53  ;;  %v582_v57 = vmul.f32 %v580_v21, %v1470_v45  ;;  %vm609_vm4 = vweird.f32 %v601_v53 }
 0x9bc   :  { %v594_v61 = vmul.f32 %v582_v57, %v582_v57  ;;  %v600_v15 = vsub.f32 %v574_v41, %v582_v57 }
 0x9c0   :  { %v1273_v59 = vpop.eup %1272 }
 0x9c1   :  { %v604_v60 = vmul.f32 %v1273_v59, %v601_v53  ;;  %v590_v54 = vpop.xlane.xlu1 %589  ;;  %vm610_vm2 = vweird.f32 %v1273_v59 }
 0x9c2   :  { %v592_v56 = vmul.f32 %v590_v54, %v1470_v45  ;;  %vm611_vm5 = vmor %vm609_vm4, %vm610_vm2 }
 0x9c3   :  { %v605_v63 = vmul.f32 %v1273_v59, %v604_v60 }
 0x9c4   :  { %v596_v62 = vsub.f32 %v592_v56, %v594_v61 }
 0x9c5   :  { %v606_v3 = vmul.f32 0.5, %v605_v63 }
 0x9c6   :  { %v598_v1 = vmax.f32 %v596_v62, 0.0 }
 0x9c7   :  { %v607_v4 = vsub.f32 1.5, %v606_v3 }
 0x9c8   :  { %v602_v2 = vadd.f32 1e-12, %v598_v1 }
 0x9c9   :  { %v608_v6 = vmul.f32 %v1273_v59, %v607_v4 }
 0x9ca   :  { %1274 = vrsqrt.f32 %v602_v2  ;;  %vm619_vm7 = vweird.f32 %v602_v2 }
 0x9cb   :  { %v612_v9 = vsel %vm611_vm5, %v1273_v59, %v608_v6 }
 0x9cc   :  { %v623_v13 = vmul.f32 %v612_v9, %v599_v11 }
 0x9ce   :  { %v626_v17 = vmul.f32 %v625_v26, %v623_v13 }
 0x9d0   :  { %v1275_v5 = vpop.eup %1274  ;;  %v1584_v22 = vadd.f32 %v628_v18, %v626_v17 }
 0x9d1   :  { %v614_v7 = vmul.f32 %v1275_v5, %v602_v2  ;;  %vm620_vm6 = vweird.f32 %v1275_v5 }
 0x9d2   :  { %vm621_vm8 = vmor %vm619_vm7, %vm620_vm6  ;;  %vm1089_vm7 = vcmask 254976  }
 0x9d3   :  { %v615_v8 = vmul.f32 %v1275_v5, %v614_v7 }
 0x9d5   :  { %v616_v10 = vmul.f32 0.5, %v615_v8 }
 0x9d7   :  { %v617_v12 = vsub.f32 1.5, %v616_v10 }
 0x9d9   :  { %v618_v14 = vmul.f32 %v1275_v5, %v617_v12 }
 0x9db   :  { %v622_v16 = vsel %vm621_vm8, %v1275_v5, %v618_v14 }
 0x9dc   :  { %v624_v27 = vmul.f32 %v622_v16, %v600_v15 }
 0x9de   :  { %v627_v20 = vmul.f32 %v625_v26, %v624_v27 }
 0x9e0   :  { %v1586_v24 = vadd.f32 %v628_v18, %v627_v20 }
 0x9e2   :  { %v650_v25 = vpack.c.bf16 %v1586_v24, %v1584_v22 }
 0x9e4   :  { %1161 = vmatmul.msk.bf16.vlgmr.msra.gmra.mxu1 %vm122_vm11, %v650_v25 }
 0xa61   :  { %v676_v29 = vpop.f32.mrf.mxu1 }
 0xa62   :  { %v677_v31 = vadd.f32 %v676_v29, %v651_v32 }
 0xa69   :  { %v678_v33 = vpop.f32.mrf.mxu1 }
 0xa6a   :  { %v679_v34 = vadd.f32 %v678_v33, %v651_v32 }
 0xa6c   :  { %v681_v35 = vpack.c.bf16 %v679_v34, %v677_v31 }
 0xa6e   :  { %683 = vrot.lane.b32.xlu2 %v681_v35, %s1364_s7  ;;  %750 = vrot.lane.b32.xlu1 %v681_v35, %s1366_s1 }
 0xa6f   :  { %752 = vrot.lane.b32.xlu0 %v681_v35, %s1363_s3 }
 0xac8   :  { %v684_v37 = vpop.permute.xlu2 %683 }
 0xac9   :  { %v689_v38 = vsel %vm252_vm3, %v684_v37, 0 }
 0xaca   :  { %698 = vmatpush.bf16.xpose.msra.mxu2 %v689_v38 }
 0xad1   :  { %1162 = vmatmul.msk.bf16.vlgmr.msra.gmra.mxu2 %vm252_vm3, %v681_v35 }
 0xae0   :  { %v751_v41 = vpop.permute.xlu1 %750 }
 0xae1   :  { %v753_v39 = vpop.permute.xlu0 %752 }
 0xae2   :  { %v758_v40 = vsel %vm252_vm3, %v753_v39, 0 }
 0xae3   :  { %767 = vmatpush.bf16.xpose.msrb.mxu3 %v758_v40 }
 0xaea   :  { %1164 = vmatmul.msk.bf16.vlgmr.msrb.gmra.mxu3 %vm252_vm3, %v751_v41 }
 0xb54   :  { %v700_v42 = vpop.f32.mrf.mxu2 }
 0xb55   :  { %v701_v43 = vadd.f32 %v700_v42, %v1517_v47 }
 0xb57   :  { %v705_v44 = vsel %vm252_vm3, %v701_v43, -inf }
 0xb58   :  { %706 = vmax.xlane.f32.xlu2 %v705_v44 }
 0xb5c   :  { %v702_v50 = vpop.f32.mrf.mxu2 }
 0xb5d   :  { %v703_v51 = vadd.f32 %v702_v50, %v1521_v0 }
 0xb5f   :  { %v708_v21 = vsel %vm252_vm3, %v703_v51, -inf }
 0xb6d   :  { %v769_v46 = vpop.f32.mrf.mxu3 }
 0xb6e   :  { %v770_v48 = vadd.f32 %v769_v46, %v1517_v47 }
 0xb70   :  { %v774_v49 = vsel %vm252_vm3, %v770_v48, -inf }
 0xb71   :  { %775 = vmax.xlane.f32.xlu0 %v774_v49 }
 0xb75   :  { %v771_v52 = vpop.f32.mrf.mxu3 }
 0xb76   :  { %v772_v36 = vadd.f32 %v771_v52, %v1521_v0 }
 0xb78   :  { %v777_v53 = vsel %vm252_vm3, %v772_v36, -inf }
 0xb79   :  { %778 = vmax.xlane.f32.xlu1 %v777_v53  ;;  %709 = vmax.xlane.f32.xlu0 %v708_v21 }
 0xbcb   :  { %v707_v47 = vpop.xlane.xlu2 %706 }
 0xbcc   :  { %v711_v1 = vsub.f32 %v701_v43, %v707_v47 }
 0xbce   :  { %v713_v4 = vmul.f32 1.442695, %v711_v1 }
 0xbe4   :  { %v776_v57 = vpop.xlane.xlu0 %775 }
 0xbe5   :  { %v780_v59 = vsub.f32 %v770_v48, %v776_v57 }
 0xbe7   :  { %v782_v60 = vmul.f32 1.442695, %v780_v59 }
 0xbe9   :  { %1276 = vpow2.f32 %v782_v60 }
 0xbec   :  { %v779_v54 = vpop.xlane.xlu1 %778  ;;  %v710_v61 = vpop.xlane.xlu0 %709 }
 0xbed   :  { %v781_v56 = vsub.f32 %v772_v36, %v779_v54  ;;  %v712_v62 = vsub.f32 %v703_v51, %v710_v61  ;;  %v830_v36 = vperm.slane %v1594_v30, 1 }
 0xbef   :  { %v1277_v63 = vpop.eup %1276  ;;  %v784_v2 = vmul.f32 1.442695, %v781_v56  ;;  %v715_v3 = vmul.f32 1.442695, %v712_v62 }
 0xbf0   :  { %v786_v0 = vsel %vm252_vm3, %v1277_v63, 0.0 }
 0xbf1   :  { %1278 = vpow2.f32 %v784_v2  ;;  %787 = vadd.xlane.f32.xlu0 %v786_v0 }
 0xbf2   :  { %1280 = vpow2.f32 %v715_v3 }
 0xbf3   :  { %1282 = vpow2.f32 %v713_v4 }
 0xbf7   :  { %v1279_v5 = vpop.eup %1278 }
 0xbf8   :  { %v1281_v6 = vpop.eup %1280  ;;  %v789_v7 = vsel %vm252_vm3, %v1279_v5, 0.0 }
 0xbf9   :  { %790 = vadd.xlane.f32.xlu1 %v789_v7  ;;  %v720_v8 = vsel %vm252_vm3, %v1281_v6, 0.0  ;;  %v1283_v9 = vpop.eup %1282 }
 0xbfa   :  { %721 = vadd.xlane.f32.xlu2 %v720_v8  ;;  %v717_v10 = vsel %vm252_vm3, %v1283_v9, 0.0 }
 0xc01   :  { %718 = vadd.xlane.f32.xlu1 %v717_v10 }
 0xc05   :  { %799 = vrot.lane.b32.xlu0 %v681_v35, %s1367_s10 }
 0xc12   :  { %833 = vrot.lane.b32.xlu2 %v1574_v55, %s1368_s11 }
 0xc1a   :  { %730 = vrot.lane.b32.xlu1 %v681_v35, %s1357_s26  ;;  %s1096_s26 = sshll.u32 %s1370_s5, 4  ;;  %s1097_s26 = int_to_ptr.vmem [resolvable:$true] %s1096_s26 }
 0xc64   :  { %v788_v11 = vpop.xlane.xlu0 %787 }
 0xc65   :  { %v792_v12 = vmax.f32 %v788_v11, 1e-30 }
 0xc67   :  { %1284 = vrcp.f32 %v792_v12 }
 0xc6c   :  { %v791_v26 = vpop.xlane.xlu1 %790 }
 0xc6d   :  { %v793_v13 = vmax.f32 %v791_v26, 1e-30  ;;  %v1285_v14 = vpop.eup %1284  ;;  %v722_v25 = vpop.xlane.xlu2 %721 }
 0xc6e   :  { %v796_v16 = vmul.f32 %v1285_v14, %v1277_v63  ;;  %v724_v29 = vmax.f32 %v722_v25, 1e-30 }
 0xc6f   :  { %1286 = vrcp.f32 %v793_v13 }
 0xc74   :  { %v719_v20 = vpop.xlane.xlu1 %718 }
 0xc75   :  { %v1287_v15 = vpop.eup %1286  ;;  %v723_v55 = vmax.f32 %v719_v20, 1e-30  ;;  %v834_v41 = vpop.permute.xlu2 %833 }
 0xc76   :  { %v797_v17 = vmul.f32 %v1287_v15, %v1279_v5  ;;  %846 = vmatpush.bf16.msrb.mxu2 %v834_v41  ;;  %v1206_v5 = vld [vmem:[#allocation2 + $0x58] sm:$0xff] }
 0xc77   :  { %v800_v27 = vpop.permute.xlu0 %799  ;;  %1288 = vrcp.f32 %v723_v55 }
 0xc78   :  { %v798_v18 = vpack.c.bf16 %v797_v17, %v796_v16  ;;  %812 = vmatpush.bf16.msrb.mxu1 %v800_v27  ;;  %1290 = vrcp.f32 %v724_v29 }
 0xc7b   :  { %1165 = vmatmul.msk.bf16.vlgmr.msrb.gmra.mxu1 %vm252_vm3, %v798_v18 }
 0xc7d   :  { %v1289_v32 = vpop.eup %1288 }
 0xc7e   :  { %v1291_v33 = vpop.eup %1290  ;;  %v727_v31 = vmul.f32 %v1289_v32, %v1283_v9 }
 0xc7f   :  { %v728_v34 = vmul.f32 %v1291_v33, %v1281_v6 }
 0xc81   :  { %v729_v37 = vpack.c.bf16 %v728_v34, %v727_v31 }
 0xc8c   :  { %v731_v35 = vpop.permute.xlu1 %730 }
 0xc8d   :  { %743 = vmatpush.bf16.msra.mxu0 %v731_v35  ;;  %v906_v35 = vperm.slane %v1594_v30, 2 }
 0xc90   :  { %1163 = vmatmul.msk.bf16.vlgmr.msra.gmra.mxu0 %vm252_vm3, %v729_v37 }
 0xc91   :  { %935 = vmatpush.bf16.msrb.mxu0 %v1206_v5 }
 0xcf8   :  { %v814_v38 = vpop.f32.mrf.mxu1 }
 0xd00   :  { %v816_v39 = vpop.f32.mrf.mxu1 }
 0xd01   :  { %v1235_v40 = vpack.i.bf16 %v816_v39, %v814_v38 }
 0xd03   :  { %1236 = vrot.lane.b32.xlu0 %v1235_v40, %s1369_s12 }
 0xd0b   :  { %831 = vrot.lane.b32.xlu0 %v1578_v58, %s1368_s11 }
 0xd0d   :  { %v745_v42 = vpop.f32.mrf.mxu0 }
 0xd15   :  { %v747_v48 = vpop.f32.mrf.mxu0 }
 0xd75   :  { %v1237_v43 = vpop.permute.xlu0 %1236 }
 0xd76   :  { %v1239_v44 = vunpack.i.h.bf16 %v1237_v43  ;;  %v1238_v46 = vunpack.i.l.bf16 %v1237_v43  ;;  %v909_v43 = vperm.slane %v1594_v30, 3 }
 0xd78   :  { %v828_v49 = vsel %vm252_vm3, %v747_v48, %v1239_v44  ;;  %v827_v50 = vsel %vm252_vm3, %v745_v42, %v1238_v46 }
 0xd79   :  { %v829_v52 = vpack.c.bf16 %v828_v49, %v827_v50  ;;  %v1210_v50 = vld [vmem:[#allocation2 + $0x78] sm:$0xff] }
 0xd7a   :  { %994 = vmatpush.bf16.msra.mxu3 %v1210_v50 }
 0xd7d   :  { %v832_v51 = vpop.permute.xlu0 %831 }
 0xd7e   :  { %847 = vmatpush.bf16.msrb.mxu2 %v832_v51  ;;  %v1209_v51 = vld [vmem:[#allocation2 + $0x70] sm:$0xff] }
 0xd7f   :  { %995 = vmatpush.bf16.msra.mxu3 %v1209_v51 }
 0xd81   :  { %1166 = vmatmul.msk.bf16.vlgmr.msrb.gmra.mxu2 %vm122_vm11, %v829_v52  ;;  %v1208_v52 = vld [vmem:[#allocation2 + $0x68] sm:$0xff] }
 0xd83   :  { %996 = vmatpush.bf16.msra.mxu3 %v1208_v52 }
 0xe04   :  { %v849_v53 = vpop.f32.mrf.mxu2 }
 0xe05   :  { %v850_v58 = vadd.f32 %v849_v53, %v830_v36  ;;  %v1207_v53 = vld [vmem:[#allocation2 + $0x60] sm:$0xff] }
 0xe06   :  { %997 = vmatpush.bf16.msra.mxu3 %v1207_v53 }
 0xe07   :  { %v854_v21 = vadd.f32 %v850_v58, %v1584_v22 }
 0xe09   :  { %v856_v57 = vsel %vm122_vm11, %v854_v21, 0.0  ;;  %v864_v59 = vmul.f32 %v854_v21, %v854_v21 }
 0xe0a   :  { %857 = vadd.xlane.f32.xlu1 %v856_v57 }
 0xe0b   :  { %v866_v60 = vsel %vm122_vm11, %v864_v59, 0.0 }
 0xe0c   :  { %v851_v47 = vpop.f32.mrf.mxu2  ;;  %867 = vadd.xlane.f32.xlu2 %v866_v60 }
 0xe0d   :  { %v852_v54 = vadd.f32 %v851_v47, %v830_v36  ;;  %v913_v36 = vperm.slane %v1594_v30, 4 }
 0xe0f   :  { %v855_v61 = vadd.f32 %v852_v54, %v1586_v24  ;;  %v1205_v24 = vld [vmem:[#allocation2 + $0x50] sm:$0xff] }
 0xe10   :  { %936 = vmatpush.bf16.msrb.mxu0 %v1205_v24 }
 0xe11   :  { %v859_v56 = vsel %vm122_vm11, %v855_v61, 0.0  ;;  %v865_v62 = vmul.f32 %v855_v61, %v855_v61 }
 0xe12   :  { %860 = vadd.xlane.f32.xlu0 %v859_v56 }
 0xe13   :  { %v869_v63 = vsel %vm122_vm11, %v865_v62, 0.0 }
 0xe14   :  { %870 = vadd.xlane.f32.xlu1 %v869_v63 }
 0xe7d   :  { %v858_v1 = vpop.xlane.xlu1 %857 }
 0xe7e   :  { %v862_v22 = vmul.f32 %v858_v1, %v1470_v45 }
 0xe7f   :  { %v868_v2 = vpop.xlane.xlu2 %867 }
 0xe80   :  { %v874_v3 = vmul.f32 %v862_v22, %v862_v22  ;;  %v872_v0 = vmul.f32 %v868_v2, %v1470_v45  ;;  %v880_v31 = vsub.f32 %v854_v21, %v862_v22 }
 0xe82   :  { %v876_v4 = vsub.f32 %v872_v0, %v874_v3 }
 0xe84   :  { %v878_v6 = vmax.f32 %v876_v4, 0.0 }
 0xe85   :  { %v861_v7 = vpop.xlane.xlu0 %860 }
 0xe86   :  { %v882_v8 = vadd.f32 1e-12, %v878_v6  ;;  %v863_v9 = vmul.f32 %v861_v7, %v1470_v45 }
 0xe87   :  { %v871_v10 = vpop.xlane.xlu1 %870 }
 0xe88   :  { %1292 = vrsqrt.f32 %v882_v8  ;;  %v875_v11 = vmul.f32 %v863_v9, %v863_v9  ;;  %v873_v12 = vmul.f32 %v871_v10, %v1470_v45  ;;  %vm890_vm10 = vweird.f32 %v882_v8 }
 0xe89   :  { %v881_v39 = vsub.f32 %v855_v61, %v863_v9  ;;  %v962_v10 = vperm.slane %v1594_v30, 5 }
 0xe8a   :  { %v877_v26 = vsub.f32 %v873_v12, %v875_v11 }
 0xe8c   :  { %v879_v13 = vmax.f32 %v877_v26, 0.0 }
 0xe8e   :  { %v1293_v14 = vpop.eup %1292  ;;  %v883_v16 = vadd.f32 1e-12, %v879_v13 }
 0xe8f   :  { %v885_v15 = vmul.f32 %v1293_v14, %v882_v8  ;;  %vm891_vm9 = vweird.f32 %v1293_v14 }
 0xe90   :  { %1294 = vrsqrt.f32 %v883_v16  ;;  %vm892_vm12 = vmor %vm890_vm10, %vm891_vm9  ;;  %vm900_vm14 = vweird.f32 %v883_v16 }
 0xe91   :  { %v886_v17 = vmul.f32 %v1293_v14, %v885_v15 }
 0xe93   :  { %v887_v27 = vmul.f32 0.5, %v886_v17 }
 0xe95   :  { %v888_v18 = vsub.f32 1.5, %v887_v27 }
 0xe96   :  { %v1295_v20 = vpop.eup %1294 }
 0xe97   :  { %v889_v25 = vmul.f32 %v1293_v14, %v888_v18  ;;  %v895_v55 = vmul.f32 %v1295_v20, %v883_v16  ;;  %vm901_vm13 = vweird.f32 %v1295_v20 }
 0xe98   :  { %vm902_vm15 = vmor %vm900_vm14, %vm901_vm13 }
 0xe99   :  { %v896_v29 = vmul.f32 %v1295_v20, %v895_v55  ;;  %v893_v32 = vsel %vm892_vm12, %v1293_v14, %v889_v25 }
 0xe9a   :  { %v904_v37 = vmul.f32 %v893_v32, %v880_v31 }
 0xe9b   :  { %v897_v33 = vmul.f32 0.5, %v896_v29 }
 0xe9c   :  { %v907_v41 = vmul.f32 %v906_v35, %v904_v37 }
 0xe9d   :  { %v898_v34 = vsub.f32 1.5, %v897_v33 }
 0xe9e   :  { %v910_v46 = vadd.f32 %v909_v43, %v907_v41 }
 0xe9f   :  { %v899_v38 = vmul.f32 %v1295_v20, %v898_v34 }
 0xea1   :  { %v903_v40 = vsel %vm902_vm15, %v1295_v20, %v899_v38 }
 0xea2   :  { %v905_v42 = vmul.f32 %v903_v40, %v881_v39 }
 0xea4   :  { %v908_v44 = vmul.f32 %v906_v35, %v905_v42 }
 0xea6   :  { %v911_v48 = vadd.f32 %v909_v43, %v908_v44 }
 0xea8   :  { %v912_v49 = vpack.c.bf16 %v911_v48, %v910_v46 }
 0xeaa   :  { %1175 = vmatmul.msk.bf16.vlgmr.msrb.gmra.mxu0 %vm122_vm11, %v912_v49 }
 0xf27   :  { %v938_v58 = vpop.f32.mrf.mxu0 }
 0xf28   :  { %v939_v21 = vadd.f32 %v938_v58, %v913_v36 }
 0xf2a   :  { %v943_v57 = vmul.f32 %v939_v21, %v939_v21 }
 0xf2c   :  { %v945_v59 = vmul.f32 %v943_v57, %v939_v21 }
 0xf2e   :  { %v947_v60 = vmul.f32 0.044715, %v945_v59 }
 0xf2f   :  { %v940_v47 = vpop.f32.mrf.mxu0 }
 0xf30   :  { %v949_v54 = vadd.f32 %v947_v60, %v939_v21  ;;  %v941_v61 = vadd.f32 %v940_v47, %v913_v36 }
 0xf32   :  { %v951_v56 = vmul.f32 0.7978846, %v949_v54  ;;  %v944_v62 = vmul.f32 %v941_v61, %v941_v61  ;;  %v1059_v54 = vperm.slane %v1594_v30, 7 }
 0xf34   :  { %v946_v63 = vmul.f32 %v944_v62, %v941_v61  ;;  %1296 = vtanh.f32 %v951_v56 }
 0xf36   :  { %v948_v1 = vmul.f32 0.044715, %v946_v63  ;;  %v1062_v63 = vmul.u32 8, %v1449_v19 }
 0xf38   :  { %v950_v22 = vadd.f32 %v948_v1, %v941_v61  ;;  %vm1063_vm6 = vcmp.eq.s32.totalorder %v1455_v23, %v1062_v63 }
 0xf3a   :  { %v952_v2 = vmul.f32 0.7978846, %v950_v22  ;;  %v1297_v3 = vpop.eup %1296 }
 0xf3b   :  { %v955_v0 = vadd.f32 1.0, %v1297_v3 }
 0xf3c   :  { %1298 = vtanh.f32 %v952_v2 }
 0xf3d   :  { %v957_v5 = vmul.f32 0.5, %v955_v0 }
 0xf3f   :  { %v959_v24 = vmul.f32 %v957_v5, %v939_v21  ;;  %v1193_v5 = vsel %vm1063_vm6, 1.0, %v1361_v28 }
 0xf42   :  { %v1299_v4 = vpop.eup %1298 }
 0xf43   :  { %v956_v6 = vadd.f32 1.0, %v1299_v4 }
 0xf45   :  { %v958_v7 = vmul.f32 0.5, %v956_v6 }
 0xf47   :  { %v960_v8 = vmul.f32 %v958_v7, %v941_v61 }
 0xf49   :  { %v961_v9 = vpack.c.bf16 %v960_v8, %v959_v24 }
 0xf4b   :  { %1192 = vmatmul.msk.bf16.vlgmr.msra.gmra.mxu3 %vm555_vm1, %v961_v9 }
 0xfce   :  { %v999_v11 = vpop.f32.mrf.mxu3 }
 0xfcf   :  { %v1000_v12 = vadd.f32 %v999_v11, %v962_v10 }
 0xfd1   :  { %v1004_v26 = vadd.f32 %v1000_v12, %v910_v46 }
 0xfd3   :  { %v1006_v13 = vsel %vm122_vm11, %v1004_v26, 0.0  ;;  %v1014_v20 = vmul.f32 %v1004_v26, %v1004_v26 }
 0xfd4   :  { %1007 = vadd.xlane.f32.xlu2 %v1006_v13 }
 0xfd5   :  { %v1016_v25 = vsel %vm122_vm11, %v1014_v20, 0.0 }
 0xfd6   :  { %v1001_v14 = vpop.f32.mrf.mxu3 }
 0xfd7   :  { %v1002_v15 = vadd.f32 %v1001_v14, %v962_v10 }
 0xfd9   :  { %v1005_v16 = vadd.f32 %v1002_v15, %v911_v48 }
 0xfdb   :  { %v1009_v17 = vsel %vm122_vm11, %v1005_v16, 0.0  ;;  %v1015_v27 = vmul.f32 %v1005_v16, %v1005_v16 }
 0xfdc   :  { %1010 = vadd.xlane.f32.xlu0 %v1009_v17 }
 0xfdd   :  { %v1019_v18 = vsel %vm122_vm11, %v1015_v27, 0.0 }
 0xfde   :  { %1020 = vadd.xlane.f32.xlu1 %v1019_v18 }
 0xfe4   :  { %1017 = vadd.xlane.f32.xlu0 %v1016_v25 }
0x1047   :  { %v1008_v32 = vpop.xlane.xlu2 %1007 }
0x1048   :  { %v1012_v35 = vmul.f32 %v1008_v32, %v1470_v45 }
0x104a   :  { %v1024_v40 = vmul.f32 %v1012_v35, %v1012_v35  ;;  %v1030_v1 = vsub.f32 %v1004_v26, %v1012_v35 }
0x104f   :  { %v1011_v55 = vpop.xlane.xlu0 %1010 }
0x1050   :  { %v1013_v29 = vmul.f32 %v1011_v55, %v1470_v45 }
0x1051   :  { %v1021_v33 = vpop.xlane.xlu1 %1020 }
0x1052   :  { %v1025_v31 = vmul.f32 %v1013_v29, %v1013_v29  ;;  %v1023_v34 = vmul.f32 %v1021_v33, %v1470_v45  ;;  %v1031_v57 = vsub.f32 %v1005_v16, %v1013_v29 }
0x1054   :  { %v1027_v37 = vsub.f32 %v1023_v34, %v1025_v31 }
0x1056   :  { %v1029_v38 = vmax.f32 %v1027_v37, 0.0 }
0x1057   :  { %v1018_v39 = vpop.xlane.xlu0 %1017 }
0x1058   :  { %v1033_v41 = vadd.f32 1e-12, %v1029_v38  ;;  %v1022_v42 = vmul.f32 %v1018_v39, %v1470_v45  ;;  %v1056_v45 = vperm.slane %v1594_v30, 6 }
0x105a   :  { %1300 = vrsqrt.f32 %v1033_v41  ;;  %v1026_v43 = vsub.f32 %v1022_v42, %v1024_v40  ;;  %vm1050_vm0 = vweird.f32 %v1033_v41 }
0x105c   :  { %v1028_v44 = vmax.f32 %v1026_v43, 0.0 }
0x105e   :  { %v1032_v46 = vadd.f32 1e-12, %v1028_v44 }
0x1060   :  { %v1301_v48 = vpop.eup %1300  ;;  %1302 = vrsqrt.f32 %v1032_v46  ;;  %vm1040_vm4 = vweird.f32 %v1032_v46 }
0x1061   :  { %v1045_v49 = vmul.f32 %v1301_v48, %v1033_v41  ;;  %vm1051_vm11 = vweird.f32 %v1301_v48 }
0x1062   :  { %vm1052_vm1 = vmor %vm1050_vm0, %vm1051_vm11 }
0x1063   :  { %v1046_v50 = vmul.f32 %v1301_v48, %v1045_v49 }
0x1065   :  { %v1047_v51 = vmul.f32 0.5, %v1046_v50 }
0x1066   :  { %v1303_v52 = vpop.eup %1302 }
0x1067   :  { %v1048_v36 = vsub.f32 1.5, %v1047_v51  ;;  %v1035_v53 = vmul.f32 %v1303_v52, %v1032_v46  ;;  %vm1041_vm2 = vweird.f32 %v1303_v52 }
0x1068   :  { %vm1042_vm5 = vmor %vm1040_vm4, %vm1041_vm2 }
0x1069   :  { %v1049_v58 = vmul.f32 %v1301_v48, %v1048_v36  ;;  %v1036_v21 = vmul.f32 %v1303_v52, %v1035_v53 }
0x106b   :  { %v1053_v59 = vsel %vm1052_vm1, %v1301_v48, %v1049_v58  ;;  %v1037_v60 = vmul.f32 0.5, %v1036_v21 }
0x106c   :  { %v1055_v47 = vmul.f32 %v1053_v59, %v1031_v57 }
0x106d   :  { %v1038_v61 = vsub.f32 1.5, %v1037_v60 }
0x106e   :  { %v1058_v56 = vmul.f32 %v1056_v45, %v1055_v47 }
0x106f   :  { %v1039_v62 = vmul.f32 %v1303_v52, %v1038_v61 }
0x1070   :  { %v1061_v22 = vadd.f32 %v1059_v54, %v1058_v56 }
0x1071   :  { %v1043_v2 = vsel %vm1042_vm5, %v1303_v52, %v1039_v62 }
0x1072   :  { %1083 = vmatpush.msra.mxu1 %v1061_v22  ;;  %v1054_v3 = vmul.f32 %v1043_v2, %v1030_v1 }
0x1074   :  { %v1057_v0 = vmul.f32 %v1056_v45, %v1054_v3 }
0x1076   :  { %v1060_v4 = vadd.f32 %v1059_v54, %v1057_v0 }
0x1078   :  { %1084 = vmatpush.msra.mxu1 %v1060_v4 }
0x1079   :  { %1194 = vmatmul.msk.f32.vlgmr.msra.gmra.mxu1 %vm252_vm3, %v1193_v5 }
0x10f6   :  { %v1086_v19 = vpop.f32.mrf.mxu1 }
0x10f7   :  { %1090 = vst.msk [vmem:[#allocation5] sm:$0x3] %vm1089_vm7, %v1086_v19 }
0x10f8   :  { %1101 = dma.vmem_to_hbm [thread:$0]  %s1097_s26, 32, %s1099_s16, [#allocation4]  }
0x10f9   :  { %1354 = dma.done.wait [#allocation4], 32  }
0x10fa   :  { %1355 = vsyncadd [#allocation4], 4294967264 }
0x10fb   :  { %1106 = vsyncpa [#allocation3], 1 }
0x10fc   :  { %1107 = vsyncpa [#allocation4], 1 }

</bundles_post_ra>
